<compile_context>
chip_gen: v7x
topology: tpu7x:2x2x1
jax: 0.10.0
libtpu: 0.0.40
codegen_flags: <defaults>
</compile_context>

<pallas_src>
import jax
import jax.numpy as jnp
from jax.experimental import pallas as pl
from jax.experimental.pallas import tpu as pltpu

SUBLANE = 8      # f32 sublane count -> batch padded to a multiple of this
GATE_ALIGN = 32  # Hg multiple so the packed 4*Hg gate block is lane-aligned (4*32=128)


def _lstm_kernel(x_ref, wih0_ref, whh0_ref, b0_ref,
                 wih1_ref, whh1_ref, b1_ref, wfc_t_ref, bfc_ref, out_ref):
    # x_ref:     (T, Bp, I)   f32, time-major, batch padded
    # wih0_ref:  (I, 4*Hg)    f32, packed gate columns [i|f|g|o], each Hg wide
    # whh0_ref:  (Hg, 4*Hg)   bf16
    # b0_ref:    (1, 4*Hg)    f32, bias_ih_l0 + bias_hh_l0
    # wih1_ref:  (Hg, 4*Hg)   bf16
    # whh1_ref:  (Hg, 4*Hg)   bf16
    # b1_ref:    (1, 4*Hg)    f32
    # wfc_t_ref: (O, Hg)      f32, fc weight transposed + hidden-padded
    # bfc_ref:   (1, O)       f32
    # out_ref:   (Bp, O)      f32
    T, B, I = x_ref.shape
    Hg = whh0_ref.shape[0]
    G = 4 * Hg
    O = wfc_t_ref.shape[0]
    bf16 = jnp.bfloat16

    whh0 = whh0_ref[...]
    wih1 = wih1_ref[...]
    whh1 = whh1_ref[...]

    # ---- Layer-0 input projection (+bias) for ALL timesteps, hoisted off the
    # serial recurrence chain.  For input_size == 1 this is a VPU broadcast mul.
    x = x_ref[...].astype(jnp.float32)
    if I == 1:
        xg0 = x * wih0_ref[...] + b0_ref[...]            # (T,B,1)*(1,G) -> (T,B,G)
    else:
        xg0 = (jnp.dot(x.reshape(T * B, I).astype(bf16),
                       wih0_ref[...].astype(bf16),
                       preferred_element_type=jnp.float32)
               + b0_ref[...]).reshape(T, B, G)

    # Hoisted bias broadcast for layer 1 (JAX does not CSE broadcast_in_dim;
    # broadcasting inside the unrolled loop would re-emit it T times).
    b1 = jnp.broadcast_to(b1_ref[...], (B, G))

    h1 = jnp.zeros((B, Hg), jnp.float32)
    c1 = jnp.zeros((B, Hg), jnp.float32)
    h2 = jnp.zeros((B, Hg), jnp.float32)
    c2 = jnp.zeros((B, Hg), jnp.float32)

    def cell(gates, c):
        # gates: (B, 4*Hg) packed [i | f | g | o].  One tanh over the whole
        # packed block gives all three sigmoid gates (sig(x)=0.5*tanh(x/2)+0.5),
        # then a narrow tanh for g and for the new cell state.  All f32.
        sig = 0.5 * jnp.tanh(0.5 * gates) + 0.5
        i = sig[:, 0 * Hg:1 * Hg]
        f = sig[:, 1 * Hg:2 * Hg]
        o = sig[:, 3 * Hg:4 * Hg]
        g = jnp.tanh(gates[:, 2 * Hg:3 * Hg])
        c_new = f * c + i * g
        h_new = o * jnp.tanh(c_new)
        return h_new, c_new

    # Static unroll: T is small (8).  Keep it unrolled — a rolled loop would
    # serialize the (independent) layer-1 dot of step t and layer-0 dot of t+1.
    for t in range(T):
        # Layer 0: only the recurrent matmul sits on the critical path.
        g1 = xg0[t] + jnp.dot(h1.astype(bf16), whh0,
                              preferred_element_type=jnp.float32)
        h1, c1 = cell(g1, c1)
        # Layer 1: two independent bf16 dots (no per-step concatenate).
        g2 = (jnp.dot(h1.astype(bf16), wih1, preferred_element_type=jnp.float32)
              + jnp.dot(h2.astype(bf16), whh1, preferred_element_type=jnp.float32)
              + b1)
        h2, c2 = cell(g2, c2)

    # Final Linear on the last-timestep top-layer hidden state.
    if O == 1:
        # N=1 matmul -> VPU multiply + lane reduction instead of a degenerate MXU dot.
        out = jnp.sum(h2 * wfc_t_ref[...], axis=-1, keepdims=True)
    else:
        out = jax.lax.dot_general(h2, wfc_t_ref[...],
                                  (((1,), (1,)), ((), ())),
                                  preferred_element_type=jnp.float32)
    out_ref[...] = (out + bfc_ref[...]).astype(out_ref.dtype)


def _round_up(n, m):
    return (n + m - 1) // m * m


def _pack_gate_cols(w, Hg, H):
    """(..., 4*H) -> (..., 4*Hg): pad each of the 4 gate slabs [i|f|g|o] to Hg cols."""
    lead = w.shape[:-1]
    w4 = w.reshape(lead + (4, H))
    w4 = jnp.pad(w4, [(0, 0)] * len(lead) + [(0, 0), (0, Hg - H)])
    return w4.reshape(lead + (4 * Hg,))


def prepare_params(params):
    """One-time host-side weight packing/padding/casting (hoisted off the per-call path)."""
    f32, bf16 = jnp.float32, jnp.bfloat16
    H = params["w_hh_l0"].shape[0]
    Hg = _round_up(H, GATE_ALIGN)

    def pad_rows(w):  # (H, 4Hg) -> (Hg, 4Hg), padded rows are zero
        return jnp.pad(w, ((0, Hg - H), (0, 0)))

    wih0 = _pack_gate_cols(params["w_ih_l0"].astype(f32), Hg, H)                  # (I, 4Hg) f32
    whh0 = pad_rows(_pack_gate_cols(params["w_hh_l0"].astype(f32), Hg, H)).astype(bf16)
    b0 = _pack_gate_cols(params["bias_l0"].astype(f32), Hg, H)                    # (1, 4Hg)
    wih1 = pad_rows(_pack_gate_cols(params["w_ih_l1"].astype(f32), Hg, H)).astype(bf16)
    whh1 = pad_rows(_pack_gate_cols(params["w_hh_l1"].astype(f32), Hg, H)).astype(bf16)
    b1 = _pack_gate_cols(params["bias_l1"].astype(f32), Hg, H)                    # (1, 4Hg)
    wfc_t = jnp.pad(params["w_fc"].astype(f32).T, ((0, 0), (0, Hg - H)))          # (O, Hg)
    bfc = params["bias_fc"].astype(f32)                                           # (1, O)
    return {"wih0": wih0, "whh0": whh0, "b0": b0,
            "wih1": wih1, "whh1": whh1, "b1": b1,
            "wfc_t": wfc_t, "bfc": bfc}


@jax.jit
def lstm_forward(x, prepped):
    """x: (B, T, input_size) f32, prepped: prepare_params(...) -> (B, output_size) f32."""
    B, T, I = x.shape
    O = prepped["wfc_t"].shape[0]
    Bp = _round_up(B, SUBLANE)

    # Time-major, batch-padded input (fuses with the pallas_call under jit).
    xp = jnp.pad(jnp.swapaxes(x, 0, 1).astype(jnp.float32),
                 ((0, 0), (0, Bp - B), (0, 0)))

    vmem = pl.BlockSpec(memory_space=pltpu.MemorySpace.VMEM)
    args = (xp, prepped["wih0"], prepped["whh0"], prepped["b0"],
            prepped["wih1"], prepped["whh1"], prepped["b1"],
            prepped["wfc_t"], prepped["bfc"])
    out = pl.pallas_call(
        _lstm_kernel,
        out_shape=jax.ShapeDtypeStruct((Bp, O), jnp.float32),
        in_specs=[vmem] * len(args),
        out_specs=vmem,
    )(*args)
    return out[:B]


def lstm_predictor(x, params):
    """Convenience wrapper (prepares weights every call; prefer prepare_params + lstm_forward)."""
    return lstm_forward(x, prepare_params(params))


def make_params(key, input_size, hidden_size, output_size):
    ks = jax.random.split(key, 10)
    H = hidden_size
    scale = 0.1

    def rnd(k, shape):
        return (scale * jax.random.normal(k, shape)).astype(jnp.float32)

    # PyTorch stores weight_ih_l0 as (4H, I); we store the transpose for (B,F)@(F,4H).
    return {
        "w_ih_l0": rnd(ks[0], (input_size, 4 * H)),
        "w_hh_l0": rnd(ks[1], (H, 4 * H)),
        "bias_l0": rnd(ks[2], (1, 4 * H)),          # bias_ih_l0 + bias_hh_l0 combined
        "w_ih_l1": rnd(ks[3], (H, 4 * H)),
        "w_hh_l1": rnd(ks[4], (H, 4 * H)),
        "bias_l1": rnd(ks[5], (1, 4 * H)),
        "w_fc":    rnd(ks[6], (H, output_size)),
        "bias_fc": rnd(ks[7], (1, output_size)),
    }


def reference_forward(x, params):
    """Pure-JAX reference replicating torch nn.LSTM (gate order i,f,g,o) + Linear."""
    B, T, _ = x.shape
    H = params["w_hh_l0"].shape[0]

    def cell(x_t, h, c, wih, whh, b):
        g = x_t @ wih + h @ whh + b
        i = jax.nn.sigmoid(g[:, 0 * H:1 * H])
        f = jax.nn.sigmoid(g[:, 1 * H:2 * H])
        gg = jnp.tanh(g[:, 2 * H:3 * H])
        o = jax.nn.sigmoid(g[:, 3 * H:4 * H])
        c = f * c + i * gg
        return o * jnp.tanh(c), c

    h1 = c1 = h2 = c2 = jnp.zeros((B, H), jnp.float32)
    for t in range(T):
        h1, c1 = cell(x[:, t, :], h1, c1,
                      params["w_ih_l0"], params["w_hh_l0"], params["bias_l0"])
        h2, c2 = cell(h1, h2, c2,
                      params["w_ih_l1"], params["w_hh_l1"], params["bias_l1"])
    return h2 @ params["w_fc"] + params["bias_fc"]


if __name__ == "__main__":
    batch, seq, input_size, hidden_size, output_size = 2, 8, 1, 32, 1

    key = jax.random.PRNGKey(0)
    kx, kp = jax.random.split(key)
    x = jax.random.normal(kx, (batch, seq, input_size), dtype=jnp.float32)
    params = make_params(kp, input_size, hidden_size, output_size)

    prepped = prepare_params(params)                  # one-time weight prep
    out = jax.block_until_ready(lstm_forward(x, prepped))

    ref = reference_forward(x, params)
    assert out.shape == (batch, output_size)
    # bf16 MXU operands in the recurrence -> tolerance loosened vs pure-f32.
    assert jnp.allclose(out, ref, atol=1e-2, rtol=1e-2), (out, ref)

    print("KERNEL_OK")
</pallas_src>

<mosaic_0001>
module attributes {stable_mosaic.version = 11 : i64} {
  func.func @_lstm_kernel(%arg0: memref<8x8x1xf32, #tpu.memory_space<vmem>>, %arg1: memref<1x128xf32, #tpu.memory_space<vmem>>, %arg2: memref<32x128xbf16, #tpu.memory_space<vmem>>, %arg3: memref<1x128xf32, #tpu.memory_space<vmem>>, %arg4: memref<32x128xbf16, #tpu.memory_space<vmem>>, %arg5: memref<32x128xbf16, #tpu.memory_space<vmem>>, %arg6: memref<1x128xf32, #tpu.memory_space<vmem>>, %arg7: memref<1x32xf32, #tpu.memory_space<vmem>>, %arg8: memref<1x1xf32, #tpu.memory_space<vmem>>, %arg9: memref<8x1xf32, #tpu.memory_space<vmem>>) attributes {dimension_semantics = [], scalar_prefetch = 0 : i64, scratch_operands = 0 : i64, tpu.core_type = #tpu.core_type<tc>} {
    %c0 = arith.constant 0 : index
    %c0_0 = arith.constant 0 : index
    %0 = vector.load %arg2[%c0, %c0_0] : memref<32x128xbf16, #tpu.memory_space<vmem>>, vector<32x128xbf16>
    %c0_1 = arith.constant 0 : index
    %c0_2 = arith.constant 0 : index
    %1 = vector.load %arg4[%c0_1, %c0_2] : memref<32x128xbf16, #tpu.memory_space<vmem>>, vector<32x128xbf16>
    %c0_3 = arith.constant 0 : index
    %c0_4 = arith.constant 0 : index
    %2 = vector.load %arg5[%c0_3, %c0_4] : memref<32x128xbf16, #tpu.memory_space<vmem>>, vector<32x128xbf16>
    %c0_5 = arith.constant 0 : index
    %c0_6 = arith.constant 0 : index
    %c0_7 = arith.constant 0 : index
    %3 = vector.load %arg0[%c0_5, %c0_6, %c0_7] : memref<8x8x1xf32, #tpu.memory_space<vmem>>, vector<8x8x1xf32>
    %c0_8 = arith.constant 0 : index
    %c0_9 = arith.constant 0 : index
    %4 = vector.load %arg1[%c0_8, %c0_9] : memref<1x128xf32, #tpu.memory_space<vmem>>, vector<1x128xf32>
    %5 = vector.shape_cast %4 : vector<1x128xf32> to vector<1x1x128xf32>
    %6 = vector.broadcast %3 : vector<8x8x1xf32> to vector<8x8x128xf32>
    %7 = vector.broadcast %5 : vector<1x1x128xf32> to vector<8x8x128xf32>
    %8 = arith.mulf %6, %7 : vector<8x8x128xf32>
    %c0_10 = arith.constant 0 : index
    %c0_11 = arith.constant 0 : index
    %9 = vector.load %arg3[%c0_10, %c0_11] : memref<1x128xf32, #tpu.memory_space<vmem>>, vector<1x128xf32>
    %10 = vector.shape_cast %9 : vector<1x128xf32> to vector<1x1x128xf32>
    %11 = vector.broadcast %10 : vector<1x1x128xf32> to vector<8x8x128xf32>
    %12 = arith.addf %8, %11 : vector<8x8x128xf32>
    %c0_12 = arith.constant 0 : index
    %c0_13 = arith.constant 0 : index
    %13 = vector.load %arg6[%c0_12, %c0_13] : memref<1x128xf32, #tpu.memory_space<vmem>>, vector<1x128xf32>
    %14 = vector.shape_cast %13 : vector<1x128xf32> to vector<1x128xf32>
    %15 = vector.broadcast %14 : vector<1x128xf32> to vector<8x128xf32>
    %cst = arith.constant 0.000000e+00 : f32
    %16 = vector.broadcast %cst : f32 to vector<8x32xf32>
    %cst_14 = arith.constant 0.000000e+00 : f32
    %17 = vector.broadcast %cst_14 : f32 to vector<8x32xf32>
    %cst_15 = arith.constant 0.000000e+00 : f32
    %18 = vector.broadcast %cst_15 : f32 to vector<8x32xf32>
    %cst_16 = arith.constant 0.000000e+00 : f32
    %19 = vector.broadcast %cst_16 : f32 to vector<8x32xf32>
    %20 = vector.extract_strided_slice %12 {offsets = [0, 0, 0], sizes = [1, 8, 128], strides = [1, 1, 1]} : vector<8x8x128xf32> to vector<1x8x128xf32>
    %21 = vector.shape_cast %20 : vector<1x8x128xf32> to vector<8x128xf32>
    %22 = arith.truncf %16 : vector<8x32xf32> to vector<8x32xbf16>
    %cst_17 = arith.constant dense<0.000000e+00> : vector<8x128xf32>
    %23 = tpu.matmul %22, %0, %cst_17 {dimension_numbers = #tpu.dot_dimension_numbers<[1], [0], [0], [1], [0, 0, 1, 1], [], []>} : vector<8x32xbf16>, vector<32x128xbf16>, vector<8x128xf32> -> vector<8x128xf32>
    %24 = arith.addf %21, %23 : vector<8x128xf32>
    %cst_18 = arith.constant 5.000000e-01 : f32
    %25 = vector.broadcast %cst_18 : f32 to vector<8x128xf32>
    %26 = arith.mulf %25, %24 : vector<8x128xf32>
    %27 = math.tanh %26 : vector<8x128xf32>
    %cst_19 = arith.constant 5.000000e-01 : f32
    %28 = vector.broadcast %cst_19 : f32 to vector<8x128xf32>
    %29 = arith.mulf %28, %27 : vector<8x128xf32>
    %cst_20 = arith.constant 5.000000e-01 : f32
    %30 = vector.broadcast %cst_20 : f32 to vector<8x128xf32>
    %31 = arith.addf %29, %30 : vector<8x128xf32>
    %32 = vector.extract_strided_slice %31 {offsets = [0, 0], sizes = [8, 32], strides = [1, 1]} : vector<8x128xf32> to vector<8x32xf32>
    %33 = vector.extract_strided_slice %31 {offsets = [0, 32], sizes = [8, 32], strides = [1, 1]} : vector<8x128xf32> to vector<8x32xf32>
    %34 = vector.extract_strided_slice %31 {offsets = [0, 96], sizes = [8, 32], strides = [1, 1]} : vector<8x128xf32> to vector<8x32xf32>
    %35 = vector.extract_strided_slice %24 {offsets = [0, 64], sizes = [8, 32], strides = [1, 1]} : vector<8x128xf32> to vector<8x32xf32>
    %36 = math.tanh %35 : vector<8x32xf32>
    %37 = arith.mulf %33, %17 : vector<8x32xf32>
    %38 = arith.mulf %32, %36 : vector<8x32xf32>
    %39 = arith.addf %37, %38 : vector<8x32xf32>
    %40 = math.tanh %39 : vector<8x32xf32>
    %41 = arith.mulf %34, %40 : vector<8x32xf32>
    %42 = arith.truncf %41 : vector<8x32xf32> to vector<8x32xbf16>
    %cst_21 = arith.constant dense<0.000000e+00> : vector<8x128xf32>
    %43 = tpu.matmul %42, %1, %cst_21 {dimension_numbers = #tpu.dot_dimension_numbers<[1], [0], [0], [1], [0, 0, 1, 1], [], []>} : vector<8x32xbf16>, vector<32x128xbf16>, vector<8x128xf32> -> vector<8x128xf32>
    %44 = arith.truncf %18 : vector<8x32xf32> to vector<8x32xbf16>
    %cst_22 = arith.constant dense<0.000000e+00> : vector<8x128xf32>
    %45 = tpu.matmul %44, %2, %cst_22 {dimension_numbers = #tpu.dot_dimension_numbers<[1], [0], [0], [1], [0, 0, 1, 1], [], []>} : vector<8x32xbf16>, vector<32x128xbf16>, vector<8x128xf32> -> vector<8x128xf32>
    %46 = arith.addf %43, %45 : vector<8x128xf32>
    %47 = arith.addf %46, %15 : vector<8x128xf32>
    %cst_23 = arith.constant 5.000000e-01 : f32
    %48 = vector.broadcast %cst_23 : f32 to vector<8x128xf32>
    %49 = arith.mulf %48, %47 : vector<8x128xf32>
    %50 = math.tanh %49 : vector<8x128xf32>
    %cst_24 = arith.constant 5.000000e-01 : f32
    %51 = vector.broadcast %cst_24 : f32 to vector<8x128xf32>
    %52 = arith.mulf %51, %50 : vector<8x128xf32>
    %cst_25 = arith.constant 5.000000e-01 : f32
    %53 = vector.broadcast %cst_25 : f32 to vector<8x128xf32>
    %54 = arith.addf %52, %53 : vector<8x128xf32>
    %55 = vector.extract_strided_slice %54 {offsets = [0, 0], sizes = [8, 32], strides = [1, 1]} : vector<8x128xf32> to vector<8x32xf32>
    %56 = vector.extract_strided_slice %54 {offsets = [0, 32], sizes = [8, 32], strides = [1, 1]} : vector<8x128xf32> to vector<8x32xf32>
    %57 = vector.extract_strided_slice %54 {offsets = [0, 96], sizes = [8, 32], strides = [1, 1]} : vector<8x128xf32> to vector<8x32xf32>
    %58 = vector.extract_strided_slice %47 {offsets = [0, 64], sizes = [8, 32], strides = [1, 1]} : vector<8x128xf32> to vector<8x32xf32>
    %59 = math.tanh %58 : vector<8x32xf32>
    %60 = arith.mulf %56, %19 : vector<8x32xf32>
    %61 = arith.mulf %55, %59 : vector<8x32xf32>
    %62 = arith.addf %60, %61 : vector<8x32xf32>
    %63 = math.tanh %62 : vector<8x32xf32>
    %64 = arith.mulf %57, %63 : vector<8x32xf32>
    %65 = vector.extract_strided_slice %12 {offsets = [1, 0, 0], sizes = [1, 8, 128], strides = [1, 1, 1]} : vector<8x8x128xf32> to vector<1x8x128xf32>
    %66 = vector.shape_cast %65 : vector<1x8x128xf32> to vector<8x128xf32>
    %67 = arith.truncf %41 : vector<8x32xf32> to vector<8x32xbf16>
    %cst_26 = arith.constant dense<0.000000e+00> : vector<8x128xf32>
    %68 = tpu.matmul %67, %0, %cst_26 {dimension_numbers = #tpu.dot_dimension_numbers<[1], [0], [0], [1], [0, 0, 1, 1], [], []>} : vector<8x32xbf16>, vector<32x128xbf16>, vector<8x128xf32> -> vector<8x128xf32>
    %69 = arith.addf %66, %68 : vector<8x128xf32>
    %cst_27 = arith.constant 5.000000e-01 : f32
    %70 = vector.broadcast %cst_27 : f32 to vector<8x128xf32>
    %71 = arith.mulf %70, %69 : vector<8x128xf32>
    %72 = math.tanh %71 : vector<8x128xf32>
    %cst_28 = arith.constant 5.000000e-01 : f32
    %73 = vector.broadcast %cst_28 : f32 to vector<8x128xf32>
    %74 = arith.mulf %73, %72 : vector<8x128xf32>
    %cst_29 = arith.constant 5.000000e-01 : f32
    %75 = vector.broadcast %cst_29 : f32 to vector<8x128xf32>
    %76 = arith.addf %74, %75 : vector<8x128xf32>
    %77 = vector.extract_strided_slice %76 {offsets = [0, 0], sizes = [8, 32], strides = [1, 1]} : vector<8x128xf32> to vector<8x32xf32>
    %78 = vector.extract_strided_slice %76 {offsets = [0, 32], sizes = [8, 32], strides = [1, 1]} : vector<8x128xf32> to vector<8x32xf32>
    %79 = vector.extract_strided_slice %76 {offsets = [0, 96], sizes = [8, 32], strides = [1, 1]} : vector<8x128xf32> to vector<8x32xf32>
    %80 = vector.extract_strided_slice %69 {offsets = [0, 64], sizes = [8, 32], strides = [1, 1]} : vector<8x128xf32> to vector<8x32xf32>
    %81 = math.tanh %80 : vector<8x32xf32>
    %82 = arith.mulf %78, %39 : vector<8x32xf32>
    %83 = arith.mulf %77, %81 : vector<8x32xf32>
    %84 = arith.addf %82, %83 : vector<8x32xf32>
    %85 = math.tanh %84 : vector<8x32xf32>
    %86 = arith.mulf %79, %85 : vector<8x32xf32>
    %87 = arith.truncf %86 : vector<8x32xf32> to vector<8x32xbf16>
    %cst_30 = arith.constant dense<0.000000e+00> : vector<8x128xf32>
    %88 = tpu.matmul %87, %1, %cst_30 {dimension_numbers = #tpu.dot_dimension_numbers<[1], [0], [0], [1], [0, 0, 1, 1], [], []>} : vector<8x32xbf16>, vector<32x128xbf16>, vector<8x128xf32> -> vector<8x128xf32>
    %89 = arith.truncf %64 : vector<8x32xf32> to vector<8x32xbf16>
    %cst_31 = arith.constant dense<0.000000e+00> : vector<8x128xf32>
    %90 = tpu.matmul %89, %2, %cst_31 {dimension_numbers = #tpu.dot_dimension_numbers<[1], [0], [0], [1], [0, 0, 1, 1], [], []>} : vector<8x32xbf16>, vector<32x128xbf16>, vector<8x128xf32> -> vector<8x128xf32>
    %91 = arith.addf %88, %90 : vector<8x128xf32>
    %92 = arith.addf %91, %15 : vector<8x128xf32>
    %cst_32 = arith.constant 5.000000e-01 : f32
    %93 = vector.broadcast %cst_32 : f32 to vector<8x128xf32>
    %94 = arith.mulf %93, %92 : vector<8x128xf32>
    %95 = math.tanh %94 : vector<8x128xf32>
    %cst_33 = arith.constant 5.000000e-01 : f32
    %96 = vector.broadcast %cst_33 : f32 to vector<8x128xf32>
    %97 = arith.mulf %96, %95 : vector<8x128xf32>
    %cst_34 = arith.constant 5.000000e-01 : f32
    %98 = vector.broadcast %cst_34 : f32 to vector<8x128xf32>
    %99 = arith.addf %97, %98 : vector<8x128xf32>
    %100 = vector.extract_strided_slice %99 {offsets = [0, 0], sizes = [8, 32], strides = [1, 1]} : vector<8x128xf32> to vector<8x32xf32>
    %101 = vector.extract_strided_slice %99 {offsets = [0, 32], sizes = [8, 32], strides = [1, 1]} : vector<8x128xf32> to vector<8x32xf32>
    %102 = vector.extract_strided_slice %99 {offsets = [0, 96], sizes = [8, 32], strides = [1, 1]} : vector<8x128xf32> to vector<8x32xf32>
    %103 = vector.extract_strided_slice %92 {offsets = [0, 64], sizes = [8, 32], strides = [1, 1]} : vector<8x128xf32> to vector<8x32xf32>
    %104 = math.tanh %103 : vector<8x32xf32>
    %105 = arith.mulf %101, %62 : vector<8x32xf32>
    %106 = arith.mulf %100, %104 : vector<8x32xf32>
    %107 = arith.addf %105, %106 : vector<8x32xf32>
    %108 = math.tanh %107 : vector<8x32xf32>
    %109 = arith.mulf %102, %108 : vector<8x32xf32>
    %110 = vector.extract_strided_slice %12 {offsets = [2, 0, 0], sizes = [1, 8, 128], strides = [1, 1, 1]} : vector<8x8x128xf32> to vector<1x8x128xf32>
    %111 = vector.shape_cast %110 : vector<1x8x128xf32> to vector<8x128xf32>
    %112 = arith.truncf %86 : vector<8x32xf32> to vector<8x32xbf16>
    %cst_35 = arith.constant dense<0.000000e+00> : vector<8x128xf32>
    %113 = tpu.matmul %112, %0, %cst_35 {dimension_numbers = #tpu.dot_dimension_numbers<[1], [0], [0], [1], [0, 0, 1, 1], [], []>} : vector<8x32xbf16>, vector<32x128xbf16>, vector<8x128xf32> -> vector<8x128xf32>
    %114 = arith.addf %111, %113 : vector<8x128xf32>
    %cst_36 = arith.constant 5.000000e-01 : f32
    %115 = vector.broadcast %cst_36 : f32 to vector<8x128xf32>
    %116 = arith.mulf %115, %114 : vector<8x128xf32>
    %117 = math.tanh %116 : vector<8x128xf32>
    %cst_37 = arith.constant 5.000000e-01 : f32
    %118 = vector.broadcast %cst_37 : f32 to vector<8x128xf32>
    %119 = arith.mulf %118, %117 : vector<8x128xf32>
    %cst_38 = arith.constant 5.000000e-01 : f32
    %120 = vector.broadcast %cst_38 : f32 to vector<8x128xf32>
    %121 = arith.addf %119, %120 : vector<8x128xf32>
    %122 = vector.extract_strided_slice %121 {offsets = [0, 0], sizes = [8, 32], strides = [1, 1]} : vector<8x128xf32> to vector<8x32xf32>
    %123 = vector.extract_strided_slice %121 {offsets = [0, 32], sizes = [8, 32], strides = [1, 1]} : vector<8x128xf32> to vector<8x32xf32>
    %124 = vector.extract_strided_slice %121 {offsets = [0, 96], sizes = [8, 32], strides = [1, 1]} : vector<8x128xf32> to vector<8x32xf32>
    %125 = vector.extract_strided_slice %114 {offsets = [0, 64], sizes = [8, 32], strides = [1, 1]} : vector<8x128xf32> to vector<8x32xf32>
    %126 = math.tanh %125 : vector<8x32xf32>
    %127 = arith.mulf %123, %84 : vector<8x32xf32>
    %128 = arith.mulf %122, %126 : vector<8x32xf32>
    %129 = arith.addf %127, %128 : vector<8x32xf32>
    %130 = math.tanh %129 : vector<8x32xf32>
    %131 = arith.mulf %124, %130 : vector<8x32xf32>
    %132 = arith.truncf %131 : vector<8x32xf32> to vector<8x32xbf16>
    %cst_39 = arith.constant dense<0.000000e+00> : vector<8x128xf32>
    %133 = tpu.matmul %132, %1, %cst_39 {dimension_numbers = #tpu.dot_dimension_numbers<[1], [0], [0], [1], [0, 0, 1, 1], [], []>} : vector<8x32xbf16>, vector<32x128xbf16>, vector<8x128xf32> -> vector<8x128xf32>
    %134 = arith.truncf %109 : vector<8x32xf32> to vector<8x32xbf16>
    %cst_40 = arith.constant dense<0.000000e+00> : vector<8x128xf32>
    %135 = tpu.matmul %134, %2, %cst_40 {dimension_numbers = #tpu.dot_dimension_numbers<[1], [0], [0], [1], [0, 0, 1, 1], [], []>} : vector<8x32xbf16>, vector<32x128xbf16>, vector<8x128xf32> -> vector<8x128xf32>
    %136 = arith.addf %133, %135 : vector<8x128xf32>
    %137 = arith.addf %136, %15 : vector<8x128xf32>
    %cst_41 = arith.constant 5.000000e-01 : f32
    %138 = vector.broadcast %cst_41 : f32 to vector<8x128xf32>
    %139 = arith.mulf %138, %137 : vector<8x128xf32>
    %140 = math.tanh %139 : vector<8x128xf32>
    %cst_42 = arith.constant 5.000000e-01 : f32
    %141 = vector.broadcast %cst_42 : f32 to vector<8x128xf32>
    %142 = arith.mulf %141, %140 : vector<8x128xf32>
    %cst_43 = arith.constant 5.000000e-01 : f32
    %143 = vector.broadcast %cst_43 : f32 to vector<8x128xf32>
    %144 = arith.addf %142, %143 : vector<8x128xf32>
    %145 = vector.extract_strided_slice %144 {offsets = [0, 0], sizes = [8, 32], strides = [1, 1]} : vector<8x128xf32> to vector<8x32xf32>
    %146 = vector.extract_strided_slice %144 {offsets = [0, 32], sizes = [8, 32], strides = [1, 1]} : vector<8x128xf32> to vector<8x32xf32>
    %147 = vector.extract_strided_slice %144 {offsets = [0, 96], sizes = [8, 32], strides = [1, 1]} : vector<8x128xf32> to vector<8x32xf32>
    %148 = vector.extract_strided_slice %137 {offsets = [0, 64], sizes = [8, 32], strides = [1, 1]} : vector<8x128xf32> to vector<8x32xf32>
    %149 = math.tanh %148 : vector<8x32xf32>
    %150 = arith.mulf %146, %107 : vector<8x32xf32>
    %151 = arith.mulf %145, %149 : vector<8x32xf32>
    %152 = arith.addf %150, %151 : vector<8x32xf32>
    %153 = math.tanh %152 : vector<8x32xf32>
    %154 = arith.mulf %147, %153 : vector<8x32xf32>
    %155 = vector.extract_strided_slice %12 {offsets = [3, 0, 0], sizes = [1, 8, 128], strides = [1, 1, 1]} : vector<8x8x128xf32> to vector<1x8x128xf32>
    %156 = vector.shape_cast %155 : vector<1x8x128xf32> to vector<8x128xf32>
    %157 = arith.truncf %131 : vector<8x32xf32> to vector<8x32xbf16>
    %cst_44 = arith.constant dense<0.000000e+00> : vector<8x128xf32>
    %158 = tpu.matmul %157, %0, %cst_44 {dimension_numbers = #tpu.dot_dimension_numbers<[1], [0], [0], [1], [0, 0, 1, 1], [], []>} : vector<8x32xbf16>, vector<32x128xbf16>, vector<8x128xf32> -> vector<8x128xf32>
    %159 = arith.addf %156, %158 : vector<8x128xf32>
    %cst_45 = arith.constant 5.000000e-01 : f32
    %160 = vector.broadcast %cst_45 : f32 to vector<8x128xf32>
    %161 = arith.mulf %160, %159 : vector<8x128xf32>
    %162 = math.tanh %161 : vector<8x128xf32>
    %cst_46 = arith.constant 5.000000e-01 : f32
    %163 = vector.broadcast %cst_46 : f32 to vector<8x128xf32>
    %164 = arith.mulf %163, %162 : vector<8x128xf32>
    %cst_47 = arith.constant 5.000000e-01 : f32
    %165 = vector.broadcast %cst_47 : f32 to vector<8x128xf32>
    %166 = arith.addf %164, %165 : vector<8x128xf32>
    %167 = vector.extract_strided_slice %166 {offsets = [0, 0], sizes = [8, 32], strides = [1, 1]} : vector<8x128xf32> to vector<8x32xf32>
    %168 = vector.extract_strided_slice %166 {offsets = [0, 32], sizes = [8, 32], strides = [1, 1]} : vector<8x128xf32> to vector<8x32xf32>
    %169 = vector.extract_strided_slice %166 {offsets = [0, 96], sizes = [8, 32], strides = [1, 1]} : vector<8x128xf32> to vector<8x32xf32>
    %170 = vector.extract_strided_slice %159 {offsets = [0, 64], sizes = [8, 32], strides = [1, 1]} : vector<8x128xf32> to vector<8x32xf32>
    %171 = math.tanh %170 : vector<8x32xf32>
    %172 = arith.mulf %168, %129 : vector<8x32xf32>
    %173 = arith.mulf %167, %171 : vector<8x32xf32>
    %174 = arith.addf %172, %173 : vector<8x32xf32>
    %175 = math.tanh %174 : vector<8x32xf32>
    %176 = arith.mulf %169, %175 : vector<8x32xf32>
    %177 = arith.truncf %176 : vector<8x32xf32> to vector<8x32xbf16>
    %cst_48 = arith.constant dense<0.000000e+00> : vector<8x128xf32>
    %178 = tpu.matmul %177, %1, %cst_48 {dimension_numbers = #tpu.dot_dimension_numbers<[1], [0], [0], [1], [0, 0, 1, 1], [], []>} : vector<8x32xbf16>, vector<32x128xbf16>, vector<8x128xf32> -> vector<8x128xf32>
    %179 = arith.truncf %154 : vector<8x32xf32> to vector<8x32xbf16>
    %cst_49 = arith.constant dense<0.000000e+00> : vector<8x128xf32>
    %180 = tpu.matmul %179, %2, %cst_49 {dimension_numbers = #tpu.dot_dimension_numbers<[1], [0], [0], [1], [0, 0, 1, 1], [], []>} : vector<8x32xbf16>, vector<32x128xbf16>, vector<8x128xf32> -> vector<8x128xf32>
    %181 = arith.addf %178, %180 : vector<8x128xf32>
    %182 = arith.addf %181, %15 : vector<8x128xf32>
    %cst_50 = arith.constant 5.000000e-01 : f32
    %183 = vector.broadcast %cst_50 : f32 to vector<8x128xf32>
    %184 = arith.mulf %183, %182 : vector<8x128xf32>
    %185 = math.tanh %184 : vector<8x128xf32>
    %cst_51 = arith.constant 5.000000e-01 : f32
    %186 = vector.broadcast %cst_51 : f32 to vector<8x128xf32>
    %187 = arith.mulf %186, %185 : vector<8x128xf32>
    %cst_52 = arith.constant 5.000000e-01 : f32
    %188 = vector.broadcast %cst_52 : f32 to vector<8x128xf32>
    %189 = arith.addf %187, %188 : vector<8x128xf32>
    %190 = vector.extract_strided_slice %189 {offsets = [0, 0], sizes = [8, 32], strides = [1, 1]} : vector<8x128xf32> to vector<8x32xf32>
    %191 = vector.extract_strided_slice %189 {offsets = [0, 32], sizes = [8, 32], strides = [1, 1]} : vector<8x128xf32> to vector<8x32xf32>
    %192 = vector.extract_strided_slice %189 {offsets = [0, 96], sizes = [8, 32], strides = [1, 1]} : vector<8x128xf32> to vector<8x32xf32>
    %193 = vector.extract_strided_slice %182 {offsets = [0, 64], sizes = [8, 32], strides = [1, 1]} : vector<8x128xf32> to vector<8x32xf32>
    %194 = math.tanh %193 : vector<8x32xf32>
    %195 = arith.mulf %191, %152 : vector<8x32xf32>
    %196 = arith.mulf %190, %194 : vector<8x32xf32>
    %197 = arith.addf %195, %196 : vector<8x32xf32>
    %198 = math.tanh %197 : vector<8x32xf32>
    %199 = arith.mulf %192, %198 : vector<8x32xf32>
    %200 = vector.extract_strided_slice %12 {offsets = [4, 0, 0], sizes = [1, 8, 128], strides = [1, 1, 1]} : vector<8x8x128xf32> to vector<1x8x128xf32>
    %201 = vector.shape_cast %200 : vector<1x8x128xf32> to vector<8x128xf32>
    %202 = arith.truncf %176 : vector<8x32xf32> to vector<8x32xbf16>
    %cst_53 = arith.constant dense<0.000000e+00> : vector<8x128xf32>
    %203 = tpu.matmul %202, %0, %cst_53 {dimension_numbers = #tpu.dot_dimension_numbers<[1], [0], [0], [1], [0, 0, 1, 1], [], []>} : vector<8x32xbf16>, vector<32x128xbf16>, vector<8x128xf32> -> vector<8x128xf32>
    %204 = arith.addf %201, %203 : vector<8x128xf32>
    %cst_54 = arith.constant 5.000000e-01 : f32
    %205 = vector.broadcast %cst_54 : f32 to vector<8x128xf32>
    %206 = arith.mulf %205, %204 : vector<8x128xf32>
    %207 = math.tanh %206 : vector<8x128xf32>
    %cst_55 = arith.constant 5.000000e-01 : f32
    %208 = vector.broadcast %cst_55 : f32 to vector<8x128xf32>
    %209 = arith.mulf %208, %207 : vector<8x128xf32>
    %cst_56 = arith.constant 5.000000e-01 : f32
    %210 = vector.broadcast %cst_56 : f32 to vector<8x128xf32>
    %211 = arith.addf %209, %210 : vector<8x128xf32>
    %212 = vector.extract_strided_slice %211 {offsets = [0, 0], sizes = [8, 32], strides = [1, 1]} : vector<8x128xf32> to vector<8x32xf32>
    %213 = vector.extract_strided_slice %211 {offsets = [0, 32], sizes = [8, 32], strides = [1, 1]} : vector<8x128xf32> to vector<8x32xf32>
    %214 = vector.extract_strided_slice %211 {offsets = [0, 96], sizes = [8, 32], strides = [1, 1]} : vector<8x128xf32> to vector<8x32xf32>
    %215 = vector.extract_strided_slice %204 {offsets = [0, 64], sizes = [8, 32], strides = [1, 1]} : vector<8x128xf32> to vector<8x32xf32>
    %216 = math.tanh %215 : vector<8x32xf32>
    %217 = arith.mulf %213, %174 : vector<8x32xf32>
    %218 = arith.mulf %212, %216 : vector<8x32xf32>
    %219 = arith.addf %217, %218 : vector<8x32xf32>
    %220 = math.tanh %219 : vector<8x32xf32>
    %221 = arith.mulf %214, %220 : vector<8x32xf32>
    %222 = arith.truncf %221 : vector<8x32xf32> to vector<8x32xbf16>
    %cst_57 = arith.constant dense<0.000000e+00> : vector<8x128xf32>
    %223 = tpu.matmul %222, %1, %cst_57 {dimension_numbers = #tpu.dot_dimension_numbers<[1], [0], [0], [1], [0, 0, 1, 1], [], []>} : vector<8x32xbf16>, vector<32x128xbf16>, vector<8x128xf32> -> vector<8x128xf32>
    %224 = arith.truncf %199 : vector<8x32xf32> to vector<8x32xbf16>
    %cst_58 = arith.constant dense<0.000000e+00> : vector<8x128xf32>
    %225 = tpu.matmul %224, %2, %cst_58 {dimension_numbers = #tpu.dot_dimension_numbers<[1], [0], [0], [1], [0, 0, 1, 1], [], []>} : vector<8x32xbf16>, vector<32x128xbf16>, vector<8x128xf32> -> vector<8x128xf32>
    %226 = arith.addf %223, %225 : vector<8x128xf32>
    %227 = arith.addf %226, %15 : vector<8x128xf32>
    %cst_59 = arith.constant 5.000000e-01 : f32
    %228 = vector.broadcast %cst_59 : f32 to vector<8x128xf32>
    %229 = arith.mulf %228, %227 : vector<8x128xf32>
    %230 = math.tanh %229 : vector<8x128xf32>
    %cst_60 = arith.constant 5.000000e-01 : f32
    %231 = vector.broadcast %cst_60 : f32 to vector<8x128xf32>
    %232 = arith.mulf %231, %230 : vector<8x128xf32>
    %cst_61 = arith.constant 5.000000e-01 : f32
    %233 = vector.broadcast %cst_61 : f32 to vector<8x128xf32>
    %234 = arith.addf %232, %233 : vector<8x128xf32>
    %235 = vector.extract_strided_slice %234 {offsets = [0, 0], sizes = [8, 32], strides = [1, 1]} : vector<8x128xf32> to vector<8x32xf32>
    %236 = vector.extract_strided_slice %234 {offsets = [0, 32], sizes = [8, 32], strides = [1, 1]} : vector<8x128xf32> to vector<8x32xf32>
    %237 = vector.extract_strided_slice %234 {offsets = [0, 96], sizes = [8, 32], strides = [1, 1]} : vector<8x128xf32> to vector<8x32xf32>
    %238 = vector.extract_strided_slice %227 {offsets = [0, 64], sizes = [8, 32], strides = [1, 1]} : vector<8x128xf32> to vector<8x32xf32>
    %239 = math.tanh %238 : vector<8x32xf32>
    %240 = arith.mulf %236, %197 : vector<8x32xf32>
    %241 = arith.mulf %235, %239 : vector<8x32xf32>
    %242 = arith.addf %240, %241 : vector<8x32xf32>
    %243 = math.tanh %242 : vector<8x32xf32>
    %244 = arith.mulf %237, %243 : vector<8x32xf32>
    %245 = vector.extract_strided_slice %12 {offsets = [5, 0, 0], sizes = [1, 8, 128], strides = [1, 1, 1]} : vector<8x8x128xf32> to vector<1x8x128xf32>
    %246 = vector.shape_cast %245 : vector<1x8x128xf32> to vector<8x128xf32>
    %247 = arith.truncf %221 : vector<8x32xf32> to vector<8x32xbf16>
    %cst_62 = arith.constant dense<0.000000e+00> : vector<8x128xf32>
    %248 = tpu.matmul %247, %0, %cst_62 {dimension_numbers = #tpu.dot_dimension_numbers<[1], [0], [0], [1], [0, 0, 1, 1], [], []>} : vector<8x32xbf16>, vector<32x128xbf16>, vector<8x128xf32> -> vector<8x128xf32>
    %249 = arith.addf %246, %248 : vector<8x128xf32>
    %cst_63 = arith.constant 5.000000e-01 : f32
    %250 = vector.broadcast %cst_63 : f32 to vector<8x128xf32>
    %251 = arith.mulf %250, %249 : vector<8x128xf32>
    %252 = math.tanh %251 : vector<8x128xf32>
    %cst_64 = arith.constant 5.000000e-01 : f32
    %253 = vector.broadcast %cst_64 : f32 to vector<8x128xf32>
    %254 = arith.mulf %253, %252 : vector<8x128xf32>
    %cst_65 = arith.constant 5.000000e-01 : f32
    %255 = vector.broadcast %cst_65 : f32 to vector<8x128xf32>
    %256 = arith.addf %254, %255 : vector<8x128xf32>
    %257 = vector.extract_strided_slice %256 {offsets = [0, 0], sizes = [8, 32], strides = [1, 1]} : vector<8x128xf32> to vector<8x32xf32>
    %258 = vector.extract_strided_slice %256 {offsets = [0, 32], sizes = [8, 32], strides = [1, 1]} : vector<8x128xf32> to vector<8x32xf32>
    %259 = vector.extract_strided_slice %256 {offsets = [0, 96], sizes = [8, 32], strides = [1, 1]} : vector<8x128xf32> to vector<8x32xf32>
    %260 = vector.extract_strided_slice %249 {offsets = [0, 64], sizes = [8, 32], strides = [1, 1]} : vector<8x128xf32> to vector<8x32xf32>
    %261 = math.tanh %260 : vector<8x32xf32>
    %262 = arith.mulf %258, %219 : vector<8x32xf32>
    %263 = arith.mulf %257, %261 : vector<8x32xf32>
    %264 = arith.addf %262, %263 : vector<8x32xf32>
    %265 = math.tanh %264 : vector<8x32xf32>
    %266 = arith.mulf %259, %265 : vector<8x32xf32>
    %267 = arith.truncf %266 : vector<8x32xf32> to vector<8x32xbf16>
    %cst_66 = arith.constant dense<0.000000e+00> : vector<8x128xf32>
    %268 = tpu.matmul %267, %1, %cst_66 {dimension_numbers = #tpu.dot_dimension_numbers<[1], [0], [0], [1], [0, 0, 1, 1], [], []>} : vector<8x32xbf16>, vector<32x128xbf16>, vector<8x128xf32> -> vector<8x128xf32>
    %269 = arith.truncf %244 : vector<8x32xf32> to vector<8x32xbf16>
    %cst_67 = arith.constant dense<0.000000e+00> : vector<8x128xf32>
    %270 = tpu.matmul %269, %2, %cst_67 {dimension_numbers = #tpu.dot_dimension_numbers<[1], [0], [0], [1], [0, 0, 1, 1], [], []>} : vector<8x32xbf16>, vector<32x128xbf16>, vector<8x128xf32> -> vector<8x128xf32>
    %271 = arith.addf %268, %270 : vector<8x128xf32>
    %272 = arith.addf %271, %15 : vector<8x128xf32>
    %cst_68 = arith.constant 5.000000e-01 : f32
    %273 = vector.broadcast %cst_68 : f32 to vector<8x128xf32>
    %274 = arith.mulf %273, %272 : vector<8x128xf32>
    %275 = math.tanh %274 : vector<8x128xf32>
    %cst_69 = arith.constant 5.000000e-01 : f32
    %276 = vector.broadcast %cst_69 : f32 to vector<8x128xf32>
    %277 = arith.mulf %276, %275 : vector<8x128xf32>
    %cst_70 = arith.constant 5.000000e-01 : f32
    %278 = vector.broadcast %cst_70 : f32 to vector<8x128xf32>
    %279 = arith.addf %277, %278 : vector<8x128xf32>
    %280 = vector.extract_strided_slice %279 {offsets = [0, 0], sizes = [8, 32], strides = [1, 1]} : vector<8x128xf32> to vector<8x32xf32>
    %281 = vector.extract_strided_slice %279 {offsets = [0, 32], sizes = [8, 32], strides = [1, 1]} : vector<8x128xf32> to vector<8x32xf32>
    %282 = vector.extract_strided_slice %279 {offsets = [0, 96], sizes = [8, 32], strides = [1, 1]} : vector<8x128xf32> to vector<8x32xf32>
    %283 = vector.extract_strided_slice %272 {offsets = [0, 64], sizes = [8, 32], strides = [1, 1]} : vector<8x128xf32> to vector<8x32xf32>
    %284 = math.tanh %283 : vector<8x32xf32>
    %285 = arith.mulf %281, %242 : vector<8x32xf32>
    %286 = arith.mulf %280, %284 : vector<8x32xf32>
    %287 = arith.addf %285, %286 : vector<8x32xf32>
    %288 = math.tanh %287 : vector<8x32xf32>
    %289 = arith.mulf %282, %288 : vector<8x32xf32>
    %290 = vector.extract_strided_slice %12 {offsets = [6, 0, 0], sizes = [1, 8, 128], strides = [1, 1, 1]} : vector<8x8x128xf32> to vector<1x8x128xf32>
    %291 = vector.shape_cast %290 : vector<1x8x128xf32> to vector<8x128xf32>
    %292 = arith.truncf %266 : vector<8x32xf32> to vector<8x32xbf16>
    %cst_71 = arith.constant dense<0.000000e+00> : vector<8x128xf32>
    %293 = tpu.matmul %292, %0, %cst_71 {dimension_numbers = #tpu.dot_dimension_numbers<[1], [0], [0], [1], [0, 0, 1, 1], [], []>} : vector<8x32xbf16>, vector<32x128xbf16>, vector<8x128xf32> -> vector<8x128xf32>
    %294 = arith.addf %291, %293 : vector<8x128xf32>
    %cst_72 = arith.constant 5.000000e-01 : f32
    %295 = vector.broadcast %cst_72 : f32 to vector<8x128xf32>
    %296 = arith.mulf %295, %294 : vector<8x128xf32>
    %297 = math.tanh %296 : vector<8x128xf32>
    %cst_73 = arith.constant 5.000000e-01 : f32
    %298 = vector.broadcast %cst_73 : f32 to vector<8x128xf32>
    %299 = arith.mulf %298, %297 : vector<8x128xf32>
    %cst_74 = arith.constant 5.000000e-01 : f32
    %300 = vector.broadcast %cst_74 : f32 to vector<8x128xf32>
    %301 = arith.addf %299, %300 : vector<8x128xf32>
    %302 = vector.extract_strided_slice %301 {offsets = [0, 0], sizes = [8, 32], strides = [1, 1]} : vector<8x128xf32> to vector<8x32xf32>
    %303 = vector.extract_strided_slice %301 {offsets = [0, 32], sizes = [8, 32], strides = [1, 1]} : vector<8x128xf32> to vector<8x32xf32>
    %304 = vector.extract_strided_slice %301 {offsets = [0, 96], sizes = [8, 32], strides = [1, 1]} : vector<8x128xf32> to vector<8x32xf32>
    %305 = vector.extract_strided_slice %294 {offsets = [0, 64], sizes = [8, 32], strides = [1, 1]} : vector<8x128xf32> to vector<8x32xf32>
    %306 = math.tanh %305 : vector<8x32xf32>
    %307 = arith.mulf %303, %264 : vector<8x32xf32>
    %308 = arith.mulf %302, %306 : vector<8x32xf32>
    %309 = arith.addf %307, %308 : vector<8x32xf32>
    %310 = math.tanh %309 : vector<8x32xf32>
    %311 = arith.mulf %304, %310 : vector<8x32xf32>
    %312 = arith.truncf %311 : vector<8x32xf32> to vector<8x32xbf16>
    %cst_75 = arith.constant dense<0.000000e+00> : vector<8x128xf32>
    %313 = tpu.matmul %312, %1, %cst_75 {dimension_numbers = #tpu.dot_dimension_numbers<[1], [0], [0], [1], [0, 0, 1, 1], [], []>} : vector<8x32xbf16>, vector<32x128xbf16>, vector<8x128xf32> -> vector<8x128xf32>
    %314 = arith.truncf %289 : vector<8x32xf32> to vector<8x32xbf16>
    %cst_76 = arith.constant dense<0.000000e+00> : vector<8x128xf32>
    %315 = tpu.matmul %314, %2, %cst_76 {dimension_numbers = #tpu.dot_dimension_numbers<[1], [0], [0], [1], [0, 0, 1, 1], [], []>} : vector<8x32xbf16>, vector<32x128xbf16>, vector<8x128xf32> -> vector<8x128xf32>
    %316 = arith.addf %313, %315 : vector<8x128xf32>
    %317 = arith.addf %316, %15 : vector<8x128xf32>
    %cst_77 = arith.constant 5.000000e-01 : f32
    %318 = vector.broadcast %cst_77 : f32 to vector<8x128xf32>
    %319 = arith.mulf %318, %317 : vector<8x128xf32>
    %320 = math.tanh %319 : vector<8x128xf32>
    %cst_78 = arith.constant 5.000000e-01 : f32
    %321 = vector.broadcast %cst_78 : f32 to vector<8x128xf32>
    %322 = arith.mulf %321, %320 : vector<8x128xf32>
    %cst_79 = arith.constant 5.000000e-01 : f32
    %323 = vector.broadcast %cst_79 : f32 to vector<8x128xf32>
    %324 = arith.addf %322, %323 : vector<8x128xf32>
    %325 = vector.extract_strided_slice %324 {offsets = [0, 0], sizes = [8, 32], strides = [1, 1]} : vector<8x128xf32> to vector<8x32xf32>
    %326 = vector.extract_strided_slice %324 {offsets = [0, 32], sizes = [8, 32], strides = [1, 1]} : vector<8x128xf32> to vector<8x32xf32>
    %327 = vector.extract_strided_slice %324 {offsets = [0, 96], sizes = [8, 32], strides = [1, 1]} : vector<8x128xf32> to vector<8x32xf32>
    %328 = vector.extract_strided_slice %317 {offsets = [0, 64], sizes = [8, 32], strides = [1, 1]} : vector<8x128xf32> to vector<8x32xf32>
    %329 = math.tanh %328 : vector<8x32xf32>
    %330 = arith.mulf %326, %287 : vector<8x32xf32>
    %331 = arith.mulf %325, %329 : vector<8x32xf32>
    %332 = arith.addf %330, %331 : vector<8x32xf32>
    %333 = math.tanh %332 : vector<8x32xf32>
    %334 = arith.mulf %327, %333 : vector<8x32xf32>
    %335 = vector.extract_strided_slice %12 {offsets = [7, 0, 0], sizes = [1, 8, 128], strides = [1, 1, 1]} : vector<8x8x128xf32> to vector<1x8x128xf32>
    %336 = vector.shape_cast %335 : vector<1x8x128xf32> to vector<8x128xf32>
    %337 = arith.truncf %311 : vector<8x32xf32> to vector<8x32xbf16>
    %cst_80 = arith.constant dense<0.000000e+00> : vector<8x128xf32>
    %338 = tpu.matmul %337, %0, %cst_80 {dimension_numbers = #tpu.dot_dimension_numbers<[1], [0], [0], [1], [0, 0, 1, 1], [], []>} : vector<8x32xbf16>, vector<32x128xbf16>, vector<8x128xf32> -> vector<8x128xf32>
    %339 = arith.addf %336, %338 : vector<8x128xf32>
    %cst_81 = arith.constant 5.000000e-01 : f32
    %340 = vector.broadcast %cst_81 : f32 to vector<8x128xf32>
    %341 = arith.mulf %340, %339 : vector<8x128xf32>
    %342 = math.tanh %341 : vector<8x128xf32>
    %cst_82 = arith.constant 5.000000e-01 : f32
    %343 = vector.broadcast %cst_82 : f32 to vector<8x128xf32>
    %344 = arith.mulf %343, %342 : vector<8x128xf32>
    %cst_83 = arith.constant 5.000000e-01 : f32
    %345 = vector.broadcast %cst_83 : f32 to vector<8x128xf32>
    %346 = arith.addf %344, %345 : vector<8x128xf32>
    %347 = vector.extract_strided_slice %346 {offsets = [0, 0], sizes = [8, 32], strides = [1, 1]} : vector<8x128xf32> to vector<8x32xf32>
    %348 = vector.extract_strided_slice %346 {offsets = [0, 32], sizes = [8, 32], strides = [1, 1]} : vector<8x128xf32> to vector<8x32xf32>
    %349 = vector.extract_strided_slice %346 {offsets = [0, 96], sizes = [8, 32], strides = [1, 1]} : vector<8x128xf32> to vector<8x32xf32>
    %350 = vector.extract_strided_slice %339 {offsets = [0, 64], sizes = [8, 32], strides = [1, 1]} : vector<8x128xf32> to vector<8x32xf32>
    %351 = math.tanh %350 : vector<8x32xf32>
    %352 = arith.mulf %348, %309 : vector<8x32xf32>
    %353 = arith.mulf %347, %351 : vector<8x32xf32>
    %354 = arith.addf %352, %353 : vector<8x32xf32>
    %355 = math.tanh %354 : vector<8x32xf32>
    %356 = arith.mulf %349, %355 : vector<8x32xf32>
    %357 = arith.truncf %356 : vector<8x32xf32> to vector<8x32xbf16>
    %cst_84 = arith.constant dense<0.000000e+00> : vector<8x128xf32>
    %358 = tpu.matmul %357, %1, %cst_84 {dimension_numbers = #tpu.dot_dimension_numbers<[1], [0], [0], [1], [0, 0, 1, 1], [], []>} : vector<8x32xbf16>, vector<32x128xbf16>, vector<8x128xf32> -> vector<8x128xf32>
    %359 = arith.truncf %334 : vector<8x32xf32> to vector<8x32xbf16>
    %cst_85 = arith.constant dense<0.000000e+00> : vector<8x128xf32>
    %360 = tpu.matmul %359, %2, %cst_85 {dimension_numbers = #tpu.dot_dimension_numbers<[1], [0], [0], [1], [0, 0, 1, 1], [], []>} : vector<8x32xbf16>, vector<32x128xbf16>, vector<8x128xf32> -> vector<8x128xf32>
    %361 = arith.addf %358, %360 : vector<8x128xf32>
    %362 = arith.addf %361, %15 : vector<8x128xf32>
    %cst_86 = arith.constant 5.000000e-01 : f32
    %363 = vector.broadcast %cst_86 : f32 to vector<8x128xf32>
    %364 = arith.mulf %363, %362 : vector<8x128xf32>
    %365 = math.tanh %364 : vector<8x128xf32>
    %cst_87 = arith.constant 5.000000e-01 : f32
    %366 = vector.broadcast %cst_87 : f32 to vector<8x128xf32>
    %367 = arith.mulf %366, %365 : vector<8x128xf32>
    %cst_88 = arith.constant 5.000000e-01 : f32
    %368 = vector.broadcast %cst_88 : f32 to vector<8x128xf32>
    %369 = arith.addf %367, %368 : vector<8x128xf32>
    %370 = vector.extract_strided_slice %369 {offsets = [0, 0], sizes = [8, 32], strides = [1, 1]} : vector<8x128xf32> to vector<8x32xf32>
    %371 = vector.extract_strided_slice %369 {offsets = [0, 32], sizes = [8, 32], strides = [1, 1]} : vector<8x128xf32> to vector<8x32xf32>
    %372 = vector.extract_strided_slice %369 {offsets = [0, 96], sizes = [8, 32], strides = [1, 1]} : vector<8x128xf32> to vector<8x32xf32>
    %373 = vector.extract_strided_slice %362 {offsets = [0, 64], sizes = [8, 32], strides = [1, 1]} : vector<8x128xf32> to vector<8x32xf32>
    %374 = math.tanh %373 : vector<8x32xf32>
    %375 = arith.mulf %371, %332 : vector<8x32xf32>
    %376 = arith.mulf %370, %374 : vector<8x32xf32>
    %377 = arith.addf %375, %376 : vector<8x32xf32>
    %378 = math.tanh %377 : vector<8x32xf32>
    %379 = arith.mulf %372, %378 : vector<8x32xf32>
    %c0_89 = arith.constant 0 : index
    %c0_90 = arith.constant 0 : index
    %380 = vector.load %arg7[%c0_89, %c0_90] : memref<1x32xf32, #tpu.memory_space<vmem>>, vector<1x32xf32>
    %381 = vector.broadcast %380 : vector<1x32xf32> to vector<8x32xf32>
    %382 = arith.mulf %379, %381 : vector<8x32xf32>
    %cst_91 = arith.constant dense<0.000000e+00> : vector<8xf32>
    %383 = vector.multi_reduction <add>, %382, %cst_91 [1] : vector<8x32xf32> to vector<8xf32>
    %384 = vector.shape_cast %383 : vector<8xf32> to vector<8x1xf32>
    %c0_92 = arith.constant 0 : index
    %c0_93 = arith.constant 0 : index
    %385 = vector.load %arg8[%c0_92, %c0_93] : memref<1x1xf32, #tpu.memory_space<vmem>>, vector<1x1xf32>
    %386 = vector.broadcast %385 : vector<1x1xf32> to vector<8x1xf32>
    %387 = arith.addf %384, %386 : vector<8x1xf32>
    %c0_94 = arith.constant 0 : index
    %c0_95 = arith.constant 0 : index
    %388 = vector.load %arg9[%c0_94, %c0_95] : memref<8x1xf32, #tpu.memory_space<vmem>>, vector<8x1xf32>
    tpu.vector_store %arg9[%c0_94, %c0_95], %387 {strides = array<i32>} : memref<8x1xf32, #tpu.memory_space<vmem>>, vector<8x1xf32>,
    return
  }
}

</mosaic_0001>

<bundles_post_ra>
// kernel: lstm_forward.1
= control target key start
LH: loop header
LB: loop body
LE: loop exit
PB: predicated region body
PF: predicated region fallthrough
CT: control target
= control target key end

     0   :  { %v2052_v0 = vmov 0.0   ;;  %vm2053_vm0 = vmmov 0   ;;  %v2054_v2 = vmov 0   ;;  %s2055_s19 = smov 64   ;;  %s2056_s20 = smov 32   ;;  %vm144_vm1 = vcmask 261120   ;;  %s2511_s2 = inlined_call_operand.vmem [shape: bf16[32,128], index: 2, kind: input, shape index: {}]   ;;  %s2512_s0 = inlined_call_operand.vmem [shape: f32[8,8,1], index: 0, kind: input, shape index: {}]   ;;  %s2513_s1 = inlined_call_operand.vmem [shape: f32[1,128], index: 1, kind: input, shape index: {}]   ;;  %s2514_s3 = inlined_call_operand.vmem [shape: f32[1,128], index: 3, kind: input, shape index: {}]   ;;  %s2515_s5 = inlined_call_operand.vmem [shape: bf16[32,128], index: 5, kind: input, shape index: {}]   ;;  %s2516_s4 = inlined_call_operand.vmem [shape: bf16[32,128], index: 4, kind: input, shape index: {}]   ;;  %s2517_s6 = inlined_call_operand.vmem [shape: f32[1,128], index: 6, kind: input, shape index: {}]   ;;  %s2518_s7 = inlined_call_operand.vmem [shape: f32[1,32], index: 7, kind: input, shape index: {}]   ;;  %s2519_s8 = inlined_call_operand.<no memory space> [shape: f32[1,1], index: 8, kind: input, shape index: {}]   ;;  %s2520_s9 = inlined_call_operand.vmem [shape: f32[8,1], index: 9, kind: output, shape index: {}]  }
   0x1   :  { %1741 = vmatprep.subr.bf16.mxu0 %v2052_v0  ;;  %v2112_v1 = vld [vmem:[%s2511_s2] sm:$0xff]   ;;  %1745 = vmatprep.mubr.msk.bf16.mxu0 %vm2053_vm0, %v2052_v0  ;;  %v2121_v3 = vld [vmem:[%s2511_s2 + $0x8] sm:$0xff]   ;;  %vm1630_vm2 = vcmask 7168  }
   0x2   :  { %1939 = vset.pattern.permute.xlu0 %v2054_v2  ;;  %1749 = vmatprep.subr.bf16.mxu1 %v2052_v0  ;;  %v47_v4 = vld [vmem:[%s2512_s0] sm:$0xff]  ;;  %v2158_v26 = vld [vmem:[%s2515_s5 + $0x8] sm:$0xff]  }
   0x3   :  { %1742 = vmatpush3.bf16.msra.mxu0 %v2112_v1  ;;  %1753 = vmatprep.mubr.msk.bf16.mxu1 %vm2053_vm0, %v2052_v0  ;;  %v2136_v5 = vld [vmem:[%s2513_s1] ss:$0 sm:$0xff]  ;;  %v2171_v28 = vld [vmem:[%s2516_s4 + $0x8] sm:$0xff]  }
   0x4   :  { %1743 = vmatprep.subr.bf16.mxu0 %v2052_v0  ;;  %58 = vperm.xlu0 %1939, %v47_v4   ;;  %v2142_v8 = vld [vmem:[%s2514_s3] ss:$0 sm:$0xff]  ;;  %v48_v30 = vld [vmem:[%s2512_s0 + $0x8] sm:$0xff] }
   0x5   :  { %1940 = vset.pattern.permute.xlu1 %v2054_v2  ;;  %v2153_v25 = vld [vmem:[%s2515_s5] sm:$0xff]  }
   0x6   :  { %1750 = vmatpush3.bf16.msra.mxu1 %v2153_v25  ;;  %v2164_v27 = vld [vmem:[%s2516_s4] sm:$0xff]  }
   0x7   :  { %1744 = vmatpush3.bf16.msra.mxu0 %v2121_v3  ;;  %1751 = vmatprep.subr.bf16.mxu1 %v2052_v0  ;;  %v2208_v42 = vld [vmem:[%s2517_s6] ss:$0 sm:$0xff] }
   0x8   :  { %1757 = vmatprep.subr.bf16.mxu0 %v2052_v0 }
   0xa   :  { %1746 = vmatmul.mubr.bf16.vlgmr.msra.gmra.mrb[0].mxu0 %v2054_v2  ;;  %1752 = vmatpush3.bf16.msra.mxu1 %v2158_v26 }
   0xb   :  { %1761 = vmatprep.mubr.msk.bf16.mxu0 %vm2053_vm0, %v2052_v0  ;;  %1758 = vmatpush3.bf16.msra.mxu0 %v2164_v27 }
   0xc   :  { %1759 = vmatprep.subr.bf16.mxu0 %v2052_v0  ;;  %1765 = vmatprep.subr.bf16.mxu1 %v2052_v0 }
   0xd   :  { %1754 = vmatmul.mubr.bf16.vlgmr.msra.gmra.mrb[0].mxu1 %v2054_v2 }
   0xe   :  { %1766 = vmatpush3.bf16.msra.mxu1 %v2112_v1  ;;  %1769 = vmatprep.mubr.msk.bf16.mxu1 %vm2053_vm0, %v2052_v0 }
   0xf   :  { %1760 = vmatpush3.bf16.msra.mxu0 %v2171_v28  ;;  %1767 = vmatprep.subr.bf16.mxu1 %v2052_v0 }
  0x10   :  { %1773 = vmatprep.subr.bf16.mxu0 %v2052_v0 }
  0x12   :  { %1768 = vmatpush3.bf16.msra.mxu1 %v2121_v3 }
  0x13   :  { %1781 = vmatprep.subr.bf16.mxu1 %v2052_v0 }
  0x83   :  { %v59_v6 = vpop.permute.xlu0 %58 }
  0x84   :  { %v102_v7 = vmul.f32 %v2136_v5, %v59_v6 }
  0x86   :  { %v117_v9 = vadd.f32 %v2142_v8, %v102_v7 }
  0xdd   :  { %v182_v10 = vpop.f32.mrb[0].mxu0 }
  0xde   :  { %v188_v11 = vadd.f32 %v182_v10, %v117_v9  ;;  %v1747_v12 = vpop.f32.mrb[1].mxu0 }
  0xdf   :  { %v185_v13 = vpop.f32.mrb[2].mxu0 }
  0xe0   :  { %1947 = vtanh.f32 %v188_v11  ;;  %v1748_v14 = vpop.f32.mrb[3].mxu0  ;;  %v189_v16 = vmul.f32 0.5, %v188_v11  ;;  %v258_v34 = vpop.f32.mrb[0].mxu1 }
  0xe1   :  { %v1755_v35 = vpop.f32.mrb[1].mxu1 }
  0xe2   :  { %1949 = vtanh.f32 %v189_v16  ;;  %v261_v36 = vpop.f32.mrb[2].mxu1 }
  0xe3   :  { %v1756_v37 = vpop.f32.mrb[3].mxu1 }
  0xea   :  { %v1948_v15 = vpop.eup %1947 }
  0xeb   :  { %196 = vrot.lane.b32.xlu0 %v1948_v15, %s2055_s19 }
  0xec   :  { %v1950_v17 = vpop.eup %1949 }
  0xed   :  { %v191_v18 = vmul.f32 0.5, %v1950_v17 }
  0xef   :  { %v192_v19 = vadd.f32 0.5, %v191_v18 }
  0xf1   :  { %v194_v22 = vmul.f32 0.0, %v192_v19 }
 0x15d   :  { %v197_v20 = vpop.permute.xlu0 %196 }
 0x15e   :  { %v199_v21 = vmul.f32 %v197_v20, %v192_v19 }
 0x160   :  { %201 = vrot.lane.b32.xlu1 %v199_v21, %s2056_s20 }
 0x1d2   :  { %v202_v23 = vpop.permute.xlu1 %201 }
 0x1d3   :  { %v2147_v24 = vadd.f32 %v202_v23, %v194_v22  ;;  %v49_v23 = vld [vmem:[%s2512_s0 + $0x10] sm:$0xff] }
 0x1d5   :  { %1951 = vtanh.f32 %v2147_v24 }
 0x1df   :  { %v1952_v29 = vpop.eup %1951 }
 0x1e0   :  { %207 = vrot.lane.b32.xlu1 %v1952_v29, %s2055_s19 }
 0x1e4   :  { %63 = vperm.xlu1 %1940, %v48_v30  }
 0x252   :  { %v208_v31 = vpop.permute.xlu1 %207 }
 0x253   :  { %v210_v32 = vmul.f32 %v208_v31, %v192_v19 }
 0x255   :  { %v211_v33 = vpack.c.bf16 %v210_v32, %v210_v32 }
 0x257   :  { %265 = vrot.lane.b32.xlu0 %v211_v33, %s2056_s20 }
 0x263   :  { %v64_v39 = vpop.permute.xlu1 %63 }
 0x264   :  { %v103_v40 = vmul.f32 %v2136_v5, %v64_v39 }
 0x266   :  { %v118_v41 = vadd.f32 %v2142_v8, %v103_v40 }
 0x2c9   :  { %v266_v38 = vpop.permute.xlu0 %265 }
 0x2ca   :  { %1762 = vmatmul.mubr.msk.bf16.vlgmr.msra.gmra.mrb[4].mxu0 %vm144_vm1, %v266_v38  ;;  %1770 = vmatmul.mubr.msk.bf16.vlgmr.msra.gmra.mrb[4].mxu1 %vm144_vm1, %v266_v38 }
 0x2cb   :  { %1782 = vmatpush3.bf16.msra.mxu1 %v2164_v27  ;;  %1774 = vmatpush3.bf16.msra.mxu0 %v2153_v25 }
 0x2cc   :  { %1783 = vmatprep.subr.bf16.mxu1 %v2052_v0  ;;  %1775 = vmatprep.subr.bf16.mxu0 %v2052_v0 }
 0x2cd   :  { %1785 = vmatprep.mubr.msk.bf16.mxu1 %vm2053_vm0, %v2052_v0  ;;  %1777 = vmatprep.mubr.msk.bf16.mxu0 %vm2053_vm0, %v2052_v0 }
 0x2cf   :  { %1784 = vmatpush3.bf16.msra.mxu1 %v2171_v28  ;;  %1776 = vmatpush3.bf16.msra.mxu0 %v2158_v26 }
 0x2d0   :  { %1789 = vmatprep.subr.bf16.mxu0 %v2052_v0  ;;  %1797 = vmatprep.subr.bf16.mxu1 %v2052_v0 }
 0x39d   :  { %v316_v43 = vpop.f32.mrb[4].mxu0  ;;  %v379_v44 = vpop.f32.mrb[4].mxu1 }
 0x39e   :  { %v317_v45 = vadd.f32 %v316_v43, %v258_v34  ;;  %v385_v46 = vadd.f32 %v379_v44, %v118_v41  ;;  %v1763_v47 = vpop.f32.mrb[5].mxu0  ;;  %v1771_v48 = vpop.f32.mrb[5].mxu1 }
 0x39f   :  { %v319_v49 = vpop.f32.mrb[6].mxu0  ;;  %v382_v50 = vpop.f32.mrb[6].mxu1 }
 0x3a0   :  { %v322_v51 = vadd.f32 %v2208_v42, %v317_v45  ;;  %1953 = vtanh.f32 %v385_v46  ;;  %v1764_v52 = vpop.f32.mrb[7].mxu0  ;;  %v1772_v53 = vpop.f32.mrb[7].mxu1  ;;  %v386_v56 = vmul.f32 0.5, %v385_v46 }
 0x3a2   :  { %1955 = vtanh.f32 %v322_v51  ;;  %v323_v57 = vmul.f32 0.5, %v322_v51 }
 0x3a3   :  { %1957 = vtanh.f32 %v386_v56 }
 0x3a4   :  { %1959 = vtanh.f32 %v323_v57 }
 0x3aa   :  { %v1954_v54 = vpop.eup %1953 }
 0x3ab   :  { %393 = vrot.lane.b32.xlu1 %v1954_v54, %s2055_s19 }
 0x3ac   :  { %v1956_v55 = vpop.eup %1955 }
 0x3ad   :  { %330 = vrot.lane.b32.xlu0 %v1956_v55, %s2055_s19  ;;  %v1958_v58 = vpop.eup %1957 }
 0x3ae   :  { %v1960_v59 = vpop.eup %1959  ;;  %v388_v60 = vmul.f32 0.5, %v1958_v58 }
 0x3af   :  { %v325_v61 = vmul.f32 0.5, %v1960_v59 }
 0x3b0   :  { %v389_v62 = vadd.f32 0.5, %v388_v60 }
 0x3b1   :  { %v326_v4 = vadd.f32 0.5, %v325_v61 }
 0x3b2   :  { %v391_v9 = vmul.f32 %v389_v62, %v2147_v24 }
 0x3b3   :  { %v328_v12 = vmul.f32 0.0, %v326_v4 }
 0x41d   :  { %v394_v63 = vpop.permute.xlu1 %393 }
 0x41e   :  { %v396_v2 = vmul.f32 %v394_v63, %v389_v62 }
 0x41f   :  { %v331_v6 = vpop.permute.xlu0 %330 }
 0x420   :  { %v333_v7 = vmul.f32 %v331_v6, %v326_v4  ;;  %398 = vrot.lane.b32.xlu1 %v396_v2, %s2056_s20 }
 0x422   :  { %335 = vrot.lane.b32.xlu0 %v333_v7, %s2056_s20 }
 0x492   :  { %v399_v10 = vpop.permute.xlu1 %398 }
 0x493   :  { %v2216_v11 = vadd.f32 %v399_v10, %v391_v9 }
 0x494   :  { %v336_v13 = vpop.permute.xlu0 %335 }
 0x495   :  { %1961 = vtanh.f32 %v2216_v11  ;;  %v2219_v14 = vadd.f32 %v336_v13, %v328_v12 }
 0x497   :  { %1963 = vtanh.f32 %v2219_v14 }
 0x49f   :  { %v1962_v15 = vpop.eup %1961 }
 0x4a0   :  { %404 = vrot.lane.b32.xlu1 %v1962_v15, %s2055_s19 }
 0x4a1   :  { %v1964_v16 = vpop.eup %1963 }
 0x4a2   :  { %341 = vrot.lane.b32.xlu0 %v1964_v16, %s2055_s19 }
 0x512   :  { %v405_v17 = vpop.permute.xlu1 %404 }
 0x513   :  { %v407_v18 = vmul.f32 %v405_v17, %v389_v62 }
 0x514   :  { %v342_v19 = vpop.permute.xlu0 %341 }
 0x515   :  { %v408_v20 = vpack.c.bf16 %v407_v18, %v407_v18  ;;  %v344_v21 = vmul.f32 %v342_v19, %v326_v4 }
 0x517   :  { %v409_v22 = vpack.c.bf16 %v344_v21, %v344_v21  ;;  %457 = vrot.lane.b32.xlu1 %v408_v20, %s2056_s20 }
 0x519   :  { %411 = vrot.lane.b32.xlu0 %v409_v22, %s2056_s20 }
 0x51d   :  { %68 = vperm.xlu0 %1939, %v49_v23  }
 0x589   :  { %v458_v24 = vpop.permute.xlu1 %457 }
 0x58a   :  { %1786 = vmatmul.mubr.msk.bf16.vlgmr.msra.gmra.mrb[8].mxu1 %vm144_vm1, %v458_v24 }
 0x58b   :  { %v412_v29 = vpop.permute.xlu0 %411  ;;  %1798 = vmatpush3.bf16.msra.mxu1 %v2153_v25  ;;  %1801 = vmatprep.mubr.msk.bf16.mxu1 %vm2053_vm0, %v2052_v0 }
 0x58c   :  { %1778 = vmatmul.mubr.msk.bf16.vlgmr.msra.gmra.mrb[8].mxu0 %vm144_vm1, %v412_v29  ;;  %1799 = vmatprep.subr.bf16.mxu1 %v2052_v0 }
 0x58d   :  { %1790 = vmatpush3.bf16.msra.mxu0 %v2112_v1  ;;  %1793 = vmatprep.mubr.msk.bf16.mxu0 %vm2053_vm0, %v2052_v0 }
 0x58e   :  { %1791 = vmatprep.subr.bf16.mxu0 %v2052_v0 }
 0x58f   :  { %1800 = vmatpush3.bf16.msra.mxu1 %v2158_v26 }
 0x590   :  { %1813 = vmatprep.subr.bf16.mxu1 %v2052_v0 }
 0x591   :  { %1792 = vmatpush3.bf16.msra.mxu0 %v2121_v3 }
 0x592   :  { %1805 = vmatprep.subr.bf16.mxu0 %v2052_v0 }
 0x594   :  { %1794 = vmatmul.mubr.msk.bf16.vlgmr.msra.gmra.mrb[12].mxu0 %vm144_vm1, %v458_v24 }
 0x595   :  { %1806 = vmatpush3.bf16.msra.mxu0 %v2164_v27  ;;  %1809 = vmatprep.mubr.msk.bf16.mxu0 %vm2053_vm0, %v2052_v0 }
 0x596   :  { %1807 = vmatprep.subr.bf16.mxu0 %v2052_v0 }
 0x599   :  { %1808 = vmatpush3.bf16.msra.mxu0 %v2171_v28 }
 0x59a   :  { %1821 = vmatprep.subr.bf16.mxu0 %v2052_v0 }
 0x59c   :  { %v69_v31 = vpop.permute.xlu0 %68 }
 0x59d   :  { %v104_v39 = vmul.f32 %v2136_v5, %v69_v31 }
 0x59f   :  { %v119_v43 = vadd.f32 %v2142_v8, %v104_v39 }
 0x65d   :  { %v496_v30 = vpop.f32.mrb[8].mxu1 }
 0x65e   :  { %v1787_v32 = vpop.f32.mrb[9].mxu1 }
 0x65f   :  { %v450_v33 = vpop.f32.mrb[8].mxu0  ;;  %v499_v34 = vpop.f32.mrb[10].mxu1 }
 0x660   :  { %v497_v35 = vadd.f32 %v496_v30, %v450_v33  ;;  %v1779_v36 = vpop.f32.mrb[9].mxu0  ;;  %v1788_v37 = vpop.f32.mrb[11].mxu1 }
 0x661   :  { %v453_v38 = vpop.f32.mrb[10].mxu0 }
 0x662   :  { %v502_v40 = vadd.f32 %v2208_v42, %v497_v35  ;;  %v1780_v41 = vpop.f32.mrb[11].mxu0 }
 0x664   :  { %1965 = vtanh.f32 %v502_v40  ;;  %v503_v51 = vmul.f32 0.5, %v502_v40 }
 0x667   :  { %v559_v44 = vpop.f32.mrb[12].mxu0 }
 0x668   :  { %v565_v45 = vadd.f32 %v559_v44, %v119_v43  ;;  %v1795_v46 = vpop.f32.mrb[13].mxu0 }
 0x669   :  { %v562_v47 = vpop.f32.mrb[14].mxu0 }
 0x66a   :  { %1967 = vtanh.f32 %v565_v45  ;;  %v1796_v48 = vpop.f32.mrb[15].mxu0  ;;  %v566_v52 = vmul.f32 0.5, %v565_v45 }
 0x66b   :  { %1969 = vtanh.f32 %v503_v51 }
 0x66c   :  { %1971 = vtanh.f32 %v566_v52 }
 0x66e   :  { %v1966_v49 = vpop.eup %1965 }
 0x66f   :  { %510 = vrot.lane.b32.xlu1 %v1966_v49, %s2055_s19 }
 0x674   :  { %v1968_v50 = vpop.eup %1967 }
 0x675   :  { %573 = vrot.lane.b32.xlu0 %v1968_v50, %s2055_s19  ;;  %v1970_v53 = vpop.eup %1969 }
 0x676   :  { %v505_v54 = vmul.f32 0.5, %v1970_v53  ;;  %v1972_v55 = vpop.eup %1971 }
 0x677   :  { %v568_v59 = vmul.f32 0.5, %v1972_v55 }
 0x678   :  { %v506_v56 = vadd.f32 0.5, %v505_v54 }
 0x679   :  { %v569_v60 = vadd.f32 0.5, %v568_v59 }
 0x67a   :  { %v508_v63 = vmul.f32 %v506_v56, %v2219_v14 }
 0x67b   :  { %v571_v6 = vmul.f32 %v569_v60, %v2216_v11  ;;  %v50_v11 = vld [vmem:[%s2512_s0 + $0x18] sm:$0xff] }
 0x6e1   :  { %v511_v57 = vpop.permute.xlu1 %510 }
 0x6e2   :  { %v513_v58 = vmul.f32 %v511_v57, %v506_v56 }
 0x6e4   :  { %515 = vrot.lane.b32.xlu1 %v513_v58, %s2056_s20 }
 0x6e7   :  { %v574_v61 = vpop.permute.xlu0 %573 }
 0x6e8   :  { %v576_v62 = vmul.f32 %v574_v61, %v569_v60 }
 0x6ea   :  { %578 = vrot.lane.b32.xlu0 %v576_v62, %s2056_s20 }
 0x756   :  { %v516_v2 = vpop.permute.xlu1 %515 }
 0x757   :  { %v2258_v4 = vadd.f32 %v516_v2, %v508_v63 }
 0x759   :  { %1973 = vtanh.f32 %v2258_v4 }
 0x75c   :  { %v579_v7 = vpop.permute.xlu0 %578 }
 0x75d   :  { %v2262_v9 = vadd.f32 %v579_v7, %v571_v6 }
 0x75f   :  { %1975 = vtanh.f32 %v2262_v9 }
 0x763   :  { %v1974_v10 = vpop.eup %1973 }
 0x764   :  { %521 = vrot.lane.b32.xlu1 %v1974_v10, %s2055_s19 }
 0x769   :  { %v1976_v12 = vpop.eup %1975 }
 0x76a   :  { %584 = vrot.lane.b32.xlu0 %v1976_v12, %s2055_s19 }
 0x7d6   :  { %v522_v13 = vpop.permute.xlu1 %521 }
 0x7d7   :  { %v524_v14 = vmul.f32 %v522_v13, %v506_v56 }
 0x7d9   :  { %v589_v15 = vpack.c.bf16 %v524_v14, %v524_v14  ;;  %v51_v14 = vld [vmem:[%s2512_s0 + $0x20] sm:$0xff] }
 0x7db   :  { %591 = vrot.lane.b32.xlu1 %v589_v15, %s2056_s20 }
 0x7dc   :  { %v585_v16 = vpop.permute.xlu0 %584 }
 0x7dd   :  { %v587_v17 = vmul.f32 %v585_v16, %v569_v60 }
 0x7df   :  { %v588_v18 = vpack.c.bf16 %v587_v17, %v587_v17  ;;  %73 = vperm.xlu1 %1940, %v50_v11  }
 0x7e1   :  { %637 = vrot.lane.b32.xlu0 %v588_v18, %s2056_s20 }
 0x84d   :  { %v592_v19 = vpop.permute.xlu1 %591 }
 0x84e   :  { %1802 = vmatmul.mubr.msk.bf16.vlgmr.msra.gmra.mrb[12].mxu1 %vm144_vm1, %v592_v19 }
 0x84f   :  { %1814 = vmatpush3.bf16.msra.mxu1 %v2112_v1  ;;  %1817 = vmatprep.mubr.msk.bf16.mxu1 %vm2053_vm0, %v2052_v0 }
 0x850   :  { %1815 = vmatprep.subr.bf16.mxu1 %v2052_v0 }
 0x853   :  { %1816 = vmatpush3.bf16.msra.mxu1 %v2121_v3  ;;  %v638_v20 = vpop.permute.xlu0 %637 }
 0x854   :  { %1810 = vmatmul.mubr.msk.bf16.vlgmr.msra.gmra.mrb[16].mxu0 %vm144_vm1, %v638_v20  ;;  %1829 = vmatprep.subr.bf16.mxu1 %v2052_v0 }
 0x855   :  { %1822 = vmatpush3.bf16.msra.mxu0 %v2153_v25  ;;  %1825 = vmatprep.mubr.msk.bf16.mxu0 %vm2053_vm0, %v2052_v0 }
 0x856   :  { %1818 = vmatmul.mubr.msk.bf16.vlgmr.msra.gmra.mrb[16].mxu1 %vm144_vm1, %v638_v20  ;;  %1823 = vmatprep.subr.bf16.mxu0 %v2052_v0 }
 0x857   :  { %1830 = vmatpush3.bf16.msra.mxu1 %v2164_v27  ;;  %1833 = vmatprep.mubr.msk.bf16.mxu1 %vm2053_vm0, %v2052_v0 }
 0x858   :  { %1831 = vmatprep.subr.bf16.mxu1 %v2052_v0 }
 0x859   :  { %1824 = vmatpush3.bf16.msra.mxu0 %v2158_v26 }
 0x85a   :  { %1837 = vmatprep.subr.bf16.mxu0 %v2052_v0 }
 0x85b   :  { %1832 = vmatpush3.bf16.msra.mxu1 %v2171_v28 }
 0x85c   :  { %1845 = vmatprep.subr.bf16.mxu1 %v2052_v0 }
 0x85e   :  { %v74_v21 = vpop.permute.xlu1 %73 }
 0x85f   :  { %v105_v29 = vmul.f32 %v2136_v5, %v74_v21 }
 0x861   :  { %v120_v34 = vadd.f32 %v2142_v8, %v105_v29 }
 0x921   :  { %v630_v22 = vpop.f32.mrb[12].mxu1 }
 0x922   :  { %v1803_v23 = vpop.f32.mrb[13].mxu1 }
 0x923   :  { %v633_v24 = vpop.f32.mrb[14].mxu1 }
 0x924   :  { %v1804_v30 = vpop.f32.mrb[15].mxu1 }
 0x927   :  { %v676_v31 = vpop.f32.mrb[16].mxu0 }
 0x928   :  { %v677_v32 = vadd.f32 %v676_v31, %v630_v22  ;;  %v1811_v33 = vpop.f32.mrb[17].mxu0 }
 0x929   :  { %v679_v35 = vpop.f32.mrb[18].mxu0  ;;  %v739_v36 = vpop.f32.mrb[16].mxu1 }
 0x92a   :  { %v682_v37 = vadd.f32 %v2208_v42, %v677_v32  ;;  %v745_v38 = vadd.f32 %v739_v36, %v120_v34  ;;  %v1812_v39 = vpop.f32.mrb[19].mxu0  ;;  %v1819_v40 = vpop.f32.mrb[17].mxu1 }
 0x92b   :  { %v742_v41 = vpop.f32.mrb[18].mxu1 }
 0x92c   :  { %1977 = vtanh.f32 %v682_v37  ;;  %v1820_v43 = vpop.f32.mrb[19].mxu1  ;;  %v683_v46 = vmul.f32 0.5, %v682_v37  ;;  %v746_v47 = vmul.f32 0.5, %v745_v38 }
 0x92d   :  { %1979 = vtanh.f32 %v745_v38 }
 0x92e   :  { %1981 = vtanh.f32 %v683_v46 }
 0x92f   :  { %1983 = vtanh.f32 %v746_v47 }
 0x936   :  { %v1978_v44 = vpop.eup %1977 }
 0x937   :  { %v1980_v45 = vpop.eup %1979  ;;  %690 = vrot.lane.b32.xlu0 %v1978_v44, %s2055_s19 }
 0x938   :  { %753 = vrot.lane.b32.xlu1 %v1980_v45, %s2055_s19  ;;  %v1982_v48 = vpop.eup %1981 }
 0x939   :  { %v1984_v49 = vpop.eup %1983  ;;  %v685_v50 = vmul.f32 0.5, %v1982_v48 }
 0x93a   :  { %v748_v51 = vmul.f32 0.5, %v1984_v49 }
 0x93b   :  { %v686_v52 = vadd.f32 0.5, %v685_v50 }
 0x93c   :  { %v749_v54 = vadd.f32 0.5, %v748_v51 }
 0x93d   :  { %v688_v58 = vmul.f32 %v686_v52, %v2258_v4 }
 0x93e   :  { %v751_v60 = vmul.f32 %v749_v54, %v2262_v9 }
 0x9a9   :  { %v691_v53 = vpop.permute.xlu0 %690 }
 0x9aa   :  { %v693_v55 = vmul.f32 %v691_v53, %v686_v52  ;;  %v754_v56 = vpop.permute.xlu1 %753 }
 0x9ab   :  { %v756_v57 = vmul.f32 %v754_v56, %v749_v54 }
 0x9ac   :  { %695 = vrot.lane.b32.xlu0 %v693_v55, %s2056_s20 }
 0x9ad   :  { %758 = vrot.lane.b32.xlu1 %v756_v57, %s2056_s20 }
 0xa1e   :  { %v696_v59 = vpop.permute.xlu0 %695 }
 0xa1f   :  { %v2302_v61 = vadd.f32 %v696_v59, %v688_v58  ;;  %v759_v62 = vpop.permute.xlu1 %758 }
 0xa20   :  { %v2304_v63 = vadd.f32 %v759_v62, %v751_v60 }
 0xa21   :  { %1985 = vtanh.f32 %v2302_v61 }
 0xa22   :  { %1987 = vtanh.f32 %v2304_v63 }
 0xa2b   :  { %v1986_v2 = vpop.eup %1985 }
 0xa2c   :  { %v1988_v6 = vpop.eup %1987  ;;  %701 = vrot.lane.b32.xlu0 %v1986_v2, %s2055_s19 }
 0xa2d   :  { %764 = vrot.lane.b32.xlu1 %v1988_v6, %s2055_s19 }
 0xa9e   :  { %v702_v7 = vpop.permute.xlu0 %701 }
 0xa9f   :  { %v704_v4 = vmul.f32 %v702_v7, %v686_v52  ;;  %v765_v10 = vpop.permute.xlu1 %764 }
 0xaa0   :  { %v767_v12 = vmul.f32 %v765_v10, %v749_v54 }
 0xaa1   :  { %v769_v9 = vpack.c.bf16 %v704_v4, %v704_v4 }
 0xaa2   :  { %v768_v13 = vpack.c.bf16 %v767_v12, %v767_v12 }
 0xaa3   :  { %771 = vrot.lane.b32.xlu0 %v769_v9, %s2056_s20 }
 0xaa4   :  { %817 = vrot.lane.b32.xlu1 %v768_v13, %s2056_s20 }
 0xaa7   :  { %78 = vperm.xlu0 %1939, %v51_v14  }
 0xb15   :  { %v772_v15 = vpop.permute.xlu0 %771 }
 0xb16   :  { %v818_v16 = vpop.permute.xlu1 %817  ;;  %1826 = vmatmul.mubr.msk.bf16.vlgmr.msra.gmra.mrb[20].mxu0 %vm144_vm1, %v772_v15 }
 0xb17   :  { %1834 = vmatmul.mubr.msk.bf16.vlgmr.msra.gmra.mrb[20].mxu1 %vm144_vm1, %v818_v16  ;;  %1838 = vmatpush3.bf16.msra.mxu0 %v2112_v1 }
 0xb18   :  { %1839 = vmatprep.subr.bf16.mxu0 %v2052_v0  ;;  %1841 = vmatprep.mubr.msk.bf16.mxu0 %vm2053_vm0, %v2052_v0 }
 0xb19   :  { %1846 = vmatpush3.bf16.msra.mxu1 %v2153_v25  ;;  %1849 = vmatprep.mubr.msk.bf16.mxu1 %vm2053_vm0, %v2052_v0 }
 0xb1a   :  { %1847 = vmatprep.subr.bf16.mxu1 %v2052_v0 }
 0xb1b   :  { %1840 = vmatpush3.bf16.msra.mxu0 %v2121_v3 }
 0xb1c   :  { %1853 = vmatprep.subr.bf16.mxu0 %v2052_v0 }
 0xb1d   :  { %1848 = vmatpush3.bf16.msra.mxu1 %v2158_v26 }
 0xb1e   :  { %1842 = vmatmul.mubr.msk.bf16.vlgmr.msra.gmra.mrb[24].mxu0 %vm144_vm1, %v818_v16  ;;  %1861 = vmatprep.subr.bf16.mxu1 %v2052_v0 }
 0xb1f   :  { %1854 = vmatpush3.bf16.msra.mxu0 %v2164_v27  ;;  %1857 = vmatprep.mubr.msk.bf16.mxu0 %vm2053_vm0, %v2052_v0 }
 0xb20   :  { %1855 = vmatprep.subr.bf16.mxu0 %v2052_v0 }
 0xb23   :  { %1856 = vmatpush3.bf16.msra.mxu0 %v2171_v28 }
 0xb24   :  { %1869 = vmatprep.subr.bf16.mxu0 %v2052_v0 }
 0xb26   :  { %v79_v11 = vpop.permute.xlu0 %78 }
 0xb27   :  { %v106_v23 = vmul.f32 %v2136_v5, %v79_v11 }
 0xb29   :  { %v121_v32 = vadd.f32 %v2142_v8, %v106_v23 }
 0xbe9   :  { %v810_v17 = vpop.f32.mrb[20].mxu0 }
 0xbea   :  { %v856_v18 = vpop.f32.mrb[20].mxu1  ;;  %v1827_v19 = vpop.f32.mrb[21].mxu0 }
 0xbeb   :  { %v857_v20 = vadd.f32 %v856_v18, %v810_v17  ;;  %v1835_v21 = vpop.f32.mrb[21].mxu1  ;;  %v813_v22 = vpop.f32.mrb[22].mxu0 }
 0xbec   :  { %v859_v24 = vpop.f32.mrb[22].mxu1  ;;  %v1828_v29 = vpop.f32.mrb[23].mxu0 }
 0xbed   :  { %v862_v30 = vadd.f32 %v2208_v42, %v857_v20  ;;  %v1836_v31 = vpop.f32.mrb[23].mxu1 }
 0xbef   :  { %1989 = vtanh.f32 %v862_v30  ;;  %v863_v40 = vmul.f32 0.5, %v862_v30 }
 0xbf1   :  { %v919_v33 = vpop.f32.mrb[24].mxu0 }
 0xbf2   :  { %v925_v34 = vadd.f32 %v919_v33, %v121_v32  ;;  %v1843_v35 = vpop.f32.mrb[25].mxu0 }
 0xbf3   :  { %v922_v36 = vpop.f32.mrb[26].mxu0 }
 0xbf4   :  { %1991 = vtanh.f32 %v925_v34  ;;  %v1844_v37 = vpop.f32.mrb[27].mxu0  ;;  %v926_v41 = vmul.f32 0.5, %v925_v34 }
 0xbf5   :  { %1993 = vtanh.f32 %v863_v40 }
 0xbf6   :  { %1995 = vtanh.f32 %v926_v41 }
 0xbf9   :  { %v1990_v38 = vpop.eup %1989 }
 0xbfa   :  { %870 = vrot.lane.b32.xlu1 %v1990_v38, %s2055_s19 }
 0xbfe   :  { %v1992_v39 = vpop.eup %1991 }
 0xbff   :  { %933 = vrot.lane.b32.xlu0 %v1992_v39, %s2055_s19  ;;  %v1994_v43 = vpop.eup %1993 }
 0xc00   :  { %v865_v44 = vmul.f32 0.5, %v1994_v43  ;;  %v1996_v45 = vpop.eup %1995 }
 0xc01   :  { %v928_v48 = vmul.f32 0.5, %v1996_v45 }
 0xc02   :  { %v866_v46 = vadd.f32 0.5, %v865_v44 }
 0xc03   :  { %v929_v50 = vadd.f32 0.5, %v928_v48 }
 0xc04   :  { %v868_v53 = vmul.f32 %v866_v46, %v2302_v61 }
 0xc05   :  { %v931_v56 = vmul.f32 %v929_v50, %v2304_v63  ;;  %v52_v63 = vld [vmem:[%s2512_s0 + $0x28] sm:$0xff] }
 0xc6c   :  { %v871_v47 = vpop.permute.xlu1 %870 }
 0xc6d   :  { %v873_v49 = vmul.f32 %v871_v47, %v866_v46 }
 0xc6f   :  { %875 = vrot.lane.b32.xlu1 %v873_v49, %s2056_s20 }
 0xc71   :  { %v934_v51 = vpop.permute.xlu0 %933 }
 0xc72   :  { %v936_v52 = vmul.f32 %v934_v51, %v929_v50 }
 0xc74   :  { %938 = vrot.lane.b32.xlu0 %v936_v52, %s2056_s20 }
 0xce1   :  { %v876_v54 = vpop.permute.xlu1 %875 }
 0xce2   :  { %v2344_v55 = vadd.f32 %v876_v54, %v868_v53 }
 0xce4   :  { %1997 = vtanh.f32 %v2344_v55 }
 0xce6   :  { %v939_v57 = vpop.permute.xlu0 %938 }
 0xce7   :  { %v2348_v58 = vadd.f32 %v939_v57, %v931_v56 }
 0xce9   :  { %1999 = vtanh.f32 %v2348_v58 }
 0xcee   :  { %v1998_v59 = vpop.eup %1997 }
 0xcef   :  { %881 = vrot.lane.b32.xlu1 %v1998_v59, %s2055_s19 }
 0xcf3   :  { %v2000_v60 = vpop.eup %1999 }
 0xcf4   :  { %944 = vrot.lane.b32.xlu0 %v2000_v60, %s2055_s19 }
 0xd61   :  { %v882_v62 = vpop.permute.xlu1 %881 }
 0xd62   :  { %v884_v61 = vmul.f32 %v882_v62, %v866_v46 }
 0xd64   :  { %v949_v2 = vpack.c.bf16 %v884_v61, %v884_v61  ;;  %v53_v61 = vld [vmem:[%s2512_s0 + $0x30] sm:$0xff] }
 0xd66   :  { %951 = vrot.lane.b32.xlu1 %v949_v2, %s2056_s20  ;;  %v945_v6 = vpop.permute.xlu0 %944 }
 0xd67   :  { %v947_v7 = vmul.f32 %v945_v6, %v929_v50 }
 0xd69   :  { %v948_v4 = vpack.c.bf16 %v947_v7, %v947_v7 }
 0xd6a   :  { %83 = vperm.xlu1 %1940, %v52_v63  }
 0xd6b   :  { %997 = vrot.lane.b32.xlu0 %v948_v4, %s2056_s20 }
 0xdd8   :  { %v952_v10 = vpop.permute.xlu1 %951 }
 0xdd9   :  { %1850 = vmatmul.mubr.msk.bf16.vlgmr.msra.gmra.mrb[24].mxu1 %vm144_vm1, %v952_v10 }
 0xdda   :  { %1862 = vmatpush3.bf16.msra.mxu1 %v2112_v1  ;;  %1865 = vmatprep.mubr.msk.bf16.mxu1 %vm2053_vm0, %v2052_v0 }
 0xddb   :  { %1863 = vmatprep.subr.bf16.mxu1 %v2052_v0 }
 0xddd   :  { %v998_v12 = vpop.permute.xlu0 %997 }
 0xdde   :  { %1864 = vmatpush3.bf16.msra.mxu1 %v2121_v3  ;;  %1858 = vmatmul.mubr.msk.bf16.vlgmr.msra.gmra.mrb[28].mxu0 %vm144_vm1, %v998_v12 }
 0xddf   :  { %1877 = vmatprep.subr.bf16.mxu1 %v2052_v0  ;;  %1870 = vmatpush3.bf16.msra.mxu0 %v2153_v25 }
 0xde0   :  { %1871 = vmatprep.subr.bf16.mxu0 %v2052_v0  ;;  %1873 = vmatprep.mubr.msk.bf16.mxu0 %vm2053_vm0, %v2052_v0 }
 0xde1   :  { %1866 = vmatmul.mubr.msk.bf16.vlgmr.msra.gmra.mrb[28].mxu1 %vm144_vm1, %v998_v12 }
 0xde2   :  { %1878 = vmatpush3.bf16.msra.mxu1 %v2164_v27  ;;  %1881 = vmatprep.mubr.msk.bf16.mxu1 %vm2053_vm0, %v2052_v0 }
 0xde3   :  { %1879 = vmatprep.subr.bf16.mxu1 %v2052_v0  ;;  %1872 = vmatpush3.bf16.msra.mxu0 %v2158_v26 }
 0xde4   :  { %1885 = vmatprep.subr.bf16.mxu0 %v2052_v0 }
 0xde6   :  { %1880 = vmatpush3.bf16.msra.mxu1 %v2171_v28 }
 0xde7   :  { %1893 = vmatprep.subr.bf16.mxu1 %v2052_v0 }
 0xde9   :  { %v84_v9 = vpop.permute.xlu1 %83 }
 0xdea   :  { %v107_v16 = vmul.f32 %v2136_v5, %v84_v9 }
 0xdec   :  { %v122_v21 = vadd.f32 %v2142_v8, %v107_v16 }
 0xeac   :  { %v990_v13 = vpop.f32.mrb[24].mxu1 }
 0xead   :  { %v1851_v14 = vpop.f32.mrb[25].mxu1 }
 0xeae   :  { %v993_v15 = vpop.f32.mrb[26].mxu1 }
 0xeaf   :  { %v1852_v11 = vpop.f32.mrb[27].mxu1 }
 0xeb1   :  { %v1036_v17 = vpop.f32.mrb[28].mxu0 }
 0xeb2   :  { %v1037_v18 = vadd.f32 %v1036_v17, %v990_v13  ;;  %v1859_v19 = vpop.f32.mrb[29].mxu0 }
 0xeb3   :  { %v1039_v20 = vpop.f32.mrb[30].mxu0 }
 0xeb4   :  { %v1042_v22 = vadd.f32 %v2208_v42, %v1037_v18  ;;  %v1099_v23 = vpop.f32.mrb[28].mxu1  ;;  %v1860_v24 = vpop.f32.mrb[31].mxu0 }
 0xeb5   :  { %v1105_v29 = vadd.f32 %v1099_v23, %v122_v21  ;;  %v1867_v30 = vpop.f32.mrb[29].mxu1 }
 0xeb6   :  { %2001 = vtanh.f32 %v1042_v22  ;;  %v1102_v31 = vpop.f32.mrb[30].mxu1  ;;  %v1043_v35 = vmul.f32 0.5, %v1042_v22 }
 0xeb7   :  { %2003 = vtanh.f32 %v1105_v29  ;;  %v1868_v32 = vpop.f32.mrb[31].mxu1  ;;  %v1106_v36 = vmul.f32 0.5, %v1105_v29 }
 0xeb8   :  { %2005 = vtanh.f32 %v1043_v35 }
 0xeb9   :  { %2007 = vtanh.f32 %v1106_v36 }
 0xec0   :  { %v2002_v33 = vpop.eup %2001 }
 0xec1   :  { %v2004_v34 = vpop.eup %2003  ;;  %1050 = vrot.lane.b32.xlu0 %v2002_v33, %s2055_s19 }
 0xec2   :  { %1113 = vrot.lane.b32.xlu1 %v2004_v34, %s2055_s19  ;;  %v2006_v37 = vpop.eup %2005 }
 0xec3   :  { %v2008_v38 = vpop.eup %2007  ;;  %v1045_v39 = vmul.f32 0.5, %v2006_v37 }
 0xec4   :  { %v1108_v40 = vmul.f32 0.5, %v2008_v38 }
 0xec5   :  { %v1046_v41 = vadd.f32 0.5, %v1045_v39 }
 0xec6   :  { %v1109_v44 = vadd.f32 0.5, %v1108_v40 }
 0xec7   :  { %v1048_v48 = vmul.f32 %v1046_v41, %v2344_v55 }
 0xec8   :  { %v1111_v50 = vmul.f32 %v1109_v44, %v2348_v58 }
 0xf33   :  { %v1051_v43 = vpop.permute.xlu0 %1050 }
 0xf34   :  { %v1053_v45 = vmul.f32 %v1051_v43, %v1046_v41  ;;  %v1114_v46 = vpop.permute.xlu1 %1113 }
 0xf35   :  { %v1116_v47 = vmul.f32 %v1114_v46, %v1109_v44 }
 0xf36   :  { %1055 = vrot.lane.b32.xlu0 %v1053_v45, %s2056_s20 }
 0xf37   :  { %1118 = vrot.lane.b32.xlu1 %v1116_v47, %s2056_s20 }
 0xfa8   :  { %v1056_v49 = vpop.permute.xlu0 %1055 }
 0xfa9   :  { %v2388_v51 = vadd.f32 %v1056_v49, %v1048_v48  ;;  %v1119_v52 = vpop.permute.xlu1 %1118  ;;  %v54_v48 = vld [vmem:[%s2512_s0 + $0x38] sm:$0xff] }
 0xfaa   :  { %v2390_v53 = vadd.f32 %v1119_v52, %v1111_v50 }
 0xfab   :  { %2009 = vtanh.f32 %v2388_v51 }
 0xfac   :  { %2011 = vtanh.f32 %v2390_v53 }
 0xfb5   :  { %v2010_v54 = vpop.eup %2009 }
 0xfb6   :  { %v2012_v56 = vpop.eup %2011  ;;  %1061 = vrot.lane.b32.xlu0 %v2010_v54, %s2055_s19  ;;  %v2045_v54 = vld [vmem:[%s2515_s5] sm:$0xff]  }
 0xfb7   :  { %1124 = vrot.lane.b32.xlu1 %v2012_v56, %s2055_s19  ;;  %v2046_v56 = vld [vmem:[%s2516_s4] sm:$0xff]  }
0x1028   :  { %v1062_v57 = vpop.permute.xlu0 %1061 }
0x1029   :  { %v1064_v55 = vmul.f32 %v1062_v57, %v1046_v41  ;;  %v1125_v59 = vpop.permute.xlu1 %1124  ;;  %v2047_v57 = vld [vmem:[%s2515_s5 + $0x8] sm:$0xff]  }
0x102a   :  { %v1127_v60 = vmul.f32 %v1125_v59, %v1109_v44 }
0x102b   :  { %v1129_v58 = vpack.c.bf16 %v1064_v55, %v1064_v55  ;;  %v2048_v55 = vld [vmem:[%s2516_s4 + $0x8] sm:$0xff]  }
0x102c   :  { %v1128_v62 = vpack.c.bf16 %v1127_v60, %v1127_v60 }
0x102d   :  { %1131 = vrot.lane.b32.xlu0 %v1129_v58, %s2056_s20 }
0x102e   :  { %1177 = vrot.lane.b32.xlu1 %v1128_v62, %s2056_s20 }
0x1031   :  { %88 = vperm.xlu0 %1939, %v53_v61   ;;  %v2049_v61 = vld [vmem:[%s2513_s1] ss:$0 sm:$0xff] }
0x109f   :  { %v1132_v2 = vpop.permute.xlu0 %1131 }
0x10a0   :  { %v1178_v6 = vpop.permute.xlu1 %1177  ;;  %1874 = vmatmul.mubr.msk.bf16.vlgmr.msra.gmra.mrb[32].mxu0 %vm144_vm1, %v1132_v2 }
0x10a1   :  { %1882 = vmatmul.mubr.msk.bf16.vlgmr.msra.gmra.mrb[32].mxu1 %vm144_vm1, %v1178_v6  ;;  %1886 = vmatpush3.bf16.msra.mxu0 %v2112_v1 }
0x10a2   :  { %1887 = vmatprep.subr.bf16.mxu0 %v2052_v0  ;;  %1889 = vmatprep.mubr.msk.bf16.mxu0 %vm2053_vm0, %v2052_v0 }
0x10a3   :  { %1894 = vmatpush3.bf16.msra.mxu1 %v2153_v25  ;;  %1897 = vmatprep.mubr.msk.bf16.mxu1 %vm2053_vm0, %v2052_v0 }
0x10a4   :  { %1895 = vmatprep.subr.bf16.mxu1 %v2052_v0 }
0x10a5   :  { %1888 = vmatpush3.bf16.msra.mxu0 %v2121_v3 }
0x10a6   :  { %1901 = vmatprep.subr.bf16.mxu0 %v2052_v0 }
0x10a7   :  { %1896 = vmatpush3.bf16.msra.mxu1 %v2158_v26 }
0x10a8   :  { %1890 = vmatmul.mubr.msk.bf16.vlgmr.msra.gmra.mrb[36].mxu0 %vm144_vm1, %v1178_v6  ;;  %1909 = vmatprep.subr.bf16.mxu1 %v2052_v0 }
0x10a9   :  { %1902 = vmatpush3.bf16.msra.mxu0 %v2164_v27  ;;  %1905 = vmatprep.mubr.msk.bf16.mxu0 %vm2053_vm0, %v2052_v0 }
0x10aa   :  { %1903 = vmatprep.subr.bf16.mxu0 %v2052_v0 }
0x10ad   :  { %1904 = vmatpush3.bf16.msra.mxu0 %v2171_v28 }
0x10ae   :  { %1917 = vmatprep.subr.bf16.mxu0 %v2052_v0 }
0x10b0   :  { %v89_v1 = vpop.permute.xlu0 %88 }
0x10b1   :  { %v108_v10 = vmul.f32 %v2136_v5, %v89_v1 }
0x10b3   :  { %v123_v14 = vadd.f32 %v2142_v8, %v108_v10 }
0x1173   :  { %v1170_v3 = vpop.f32.mrb[32].mxu0 }
0x1174   :  { %v1216_v25 = vpop.f32.mrb[32].mxu1  ;;  %v1875_v7 = vpop.f32.mrb[33].mxu0 }
0x1175   :  { %v1217_v26 = vadd.f32 %v1216_v25, %v1170_v3  ;;  %v1883_v63 = vpop.f32.mrb[33].mxu1  ;;  %v1173_v4 = vpop.f32.mrb[34].mxu0  ;;  %v2050_v7 = vld [vmem:[%s2514_s3] ss:$0 sm:$0xff] }
0x1176   :  { %v1219_v12 = vpop.f32.mrb[34].mxu1  ;;  %v1876_v27 = vpop.f32.mrb[35].mxu0 }
0x1177   :  { %v1222_v9 = vadd.f32 %v2208_v42, %v1217_v26  ;;  %v1884_v13 = vpop.f32.mrb[35].mxu1 }
0x1179   :  { %2013 = vtanh.f32 %v1222_v9  ;;  %v1223_v5 = vmul.f32 0.5, %v1222_v9 }
0x117b   :  { %v1279_v28 = vpop.f32.mrb[36].mxu0 }
0x117c   :  { %v1285_v15 = vadd.f32 %v1279_v28, %v123_v14  ;;  %v1891_v16 = vpop.f32.mrb[37].mxu0 }
0x117d   :  { %v1282_v11 = vpop.f32.mrb[38].mxu0 }
0x117e   :  { %2015 = vtanh.f32 %v1285_v15  ;;  %v1892_v17 = vpop.f32.mrb[39].mxu0  ;;  %v1286_v20 = vmul.f32 0.5, %v1285_v15 }
0x117f   :  { %2017 = vtanh.f32 %v1223_v5 }
0x1180   :  { %2019 = vtanh.f32 %v1286_v20 }
0x1183   :  { %v2014_v18 = vpop.eup %2013 }
0x1184   :  { %1230 = vrot.lane.b32.xlu1 %v2014_v18, %s2055_s19 }
0x1188   :  { %v2016_v19 = vpop.eup %2015 }
0x1189   :  { %1293 = vrot.lane.b32.xlu0 %v2016_v19, %s2055_s19  ;;  %v2018_v21 = vpop.eup %2017 }
0x118a   :  { %v1225_v22 = vmul.f32 0.5, %v2018_v21  ;;  %v2020_v23 = vpop.eup %2019 }
0x118b   :  { %v1288_v29 = vmul.f32 0.5, %v2020_v23 }
0x118c   :  { %v1226_v8 = vadd.f32 0.5, %v1225_v22 }
0x118d   :  { %v1289_v31 = vadd.f32 0.5, %v1288_v29 }
0x118e   :  { %v1228_v34 = vmul.f32 %v1226_v8, %v2388_v51  ;;  %v2043_v51 = vld [vmem:[%s2511_s2] sm:$0xff]  }
0x118f   :  { %v1291_v37 = vmul.f32 %v1289_v31, %v2390_v53  ;;  %v2044_v53 = vld [vmem:[%s2511_s2 + $0x8] sm:$0xff]  }
0x11f6   :  { %v1231_v24 = vpop.permute.xlu1 %1230 }
0x11f7   :  { %v1233_v30 = vmul.f32 %v1231_v24, %v1226_v8 }
0x11f9   :  { %1235 = vrot.lane.b32.xlu1 %v1233_v30, %s2056_s20 }
0x11fb   :  { %v1294_v32 = vpop.permute.xlu0 %1293 }
0x11fc   :  { %v1296_v33 = vmul.f32 %v1294_v32, %v1289_v31 }
0x11fe   :  { %1298 = vrot.lane.b32.xlu0 %v1296_v33, %s2056_s20 }
0x126b   :  { %v1236_v35 = vpop.permute.xlu1 %1235 }
0x126c   :  { %v2430_v36 = vadd.f32 %v1236_v35, %v1228_v34 }
0x126e   :  { %2021 = vtanh.f32 %v2430_v36 }
0x1270   :  { %v1299_v38 = vpop.permute.xlu0 %1298 }
0x1271   :  { %v2434_v39 = vadd.f32 %v1299_v38, %v1291_v37 }
0x1273   :  { %2023 = vtanh.f32 %v2434_v39 }
0x1278   :  { %v2022_v40 = vpop.eup %2021 }
0x1279   :  { %1241 = vrot.lane.b32.xlu1 %v2022_v40, %s2055_s19 }
0x127d   :  { %v2024_v41 = vpop.eup %2023 }
0x127e   :  { %1304 = vrot.lane.b32.xlu0 %v2024_v41, %s2055_s19 }
0x12eb   :  { %v1242_v43 = vpop.permute.xlu1 %1241 }
0x12ec   :  { %v1244_v44 = vmul.f32 %v1242_v43, %v1226_v8 }
0x12ee   :  { %v1309_v45 = vpack.c.bf16 %v1244_v44, %v1244_v44 }
0x12f0   :  { %1311 = vrot.lane.b32.xlu1 %v1309_v45, %s2056_s20  ;;  %v1305_v46 = vpop.permute.xlu0 %1304 }
0x12f1   :  { %v1307_v47 = vmul.f32 %v1305_v46, %v1289_v31 }
0x12f3   :  { %v1308_v49 = vpack.c.bf16 %v1307_v47, %v1307_v47 }
0x12f4   :  { %93 = vperm.xlu1 %1940, %v54_v48  }
0x12f5   :  { %1357 = vrot.lane.b32.xlu0 %v1308_v49, %s2056_s20 }
0x1362   :  { %v1312_v50 = vpop.permute.xlu1 %1311 }
0x1363   :  { %1898 = vmatmul.mubr.msk.bf16.vlgmr.msra.gmra.mrb[36].mxu1 %vm144_vm1, %v1312_v50 }
0x1364   :  { %1910 = vmatpush3.bf16.msra.mxu1 %v2043_v51  ;;  %1913 = vmatprep.mubr.msk.bf16.mxu1 %vm2053_vm0, %v2052_v0 }
0x1365   :  { %1911 = vmatprep.subr.bf16.mxu1 %v2052_v0 }
0x1367   :  { %v1358_v52 = vpop.permute.xlu0 %1357 }
0x1368   :  { %1912 = vmatpush3.bf16.msra.mxu1 %v2044_v53  ;;  %1906 = vmatmul.mubr.msk.bf16.vlgmr.msra.gmra.mrb[40].mxu0 %vm144_vm1, %v1358_v52 }
0x1369   :  { %1925 = vmatprep.subr.bf16.mxu1 %v2052_v0  ;;  %1918 = vmatpush3.bf16.msra.mxu0 %v2045_v54 }
0x136a   :  { %1919 = vmatprep.subr.bf16.mxu0 %v2052_v0  ;;  %1921 = vmatprep.mubr.msk.bf16.mxu0 %vm2053_vm0, %v2052_v0 }
0x136b   :  { %1914 = vmatmul.mubr.msk.bf16.vlgmr.msra.gmra.mrb[40].mxu1 %vm144_vm1, %v1358_v52  ;;  %v2051_v52 = vld [vmem:[%s2517_s6] ss:$0 sm:$0xff]  ;;  %s2057_s6 = smov 96  }
0x136c   :  { %1926 = vmatpush3.bf16.msra.mxu1 %v2046_v56  ;;  %1929 = vmatprep.mubr.msk.bf16.mxu1 %vm2053_vm0, %v2052_v0 }
0x136d   :  { %1927 = vmatprep.subr.bf16.mxu1 %v2052_v0  ;;  %1920 = vmatpush3.bf16.msra.mxu0 %v2047_v57 }
0x1370   :  { %1928 = vmatpush3.bf16.msra.mxu1 %v2048_v55 }
0x1373   :  { %v94_v59 = vpop.permute.xlu1 %93 }
0x1374   :  { %v109_v2 = vmul.f32 %v2049_v61, %v94_v59  ;;  %v1667_v61 = vld [vmem:[%s2518_s7] ss:$0 sm:$0xff] }
0x1376   :  { %v124_v26 = vadd.f32 %v2050_v7, %v109_v2 }
0x1436   :  { %v1350_v60 = vpop.f32.mrb[36].mxu1 }
0x1437   :  { %v1899_v58 = vpop.f32.mrb[37].mxu1 }
0x1438   :  { %v1353_v62 = vpop.f32.mrb[38].mxu1 }
0x1439   :  { %v1900_v0 = vpop.f32.mrb[39].mxu1 }
0x143b   :  { %v1396_v6 = vpop.f32.mrb[40].mxu0 }
0x143c   :  { %v1397_v1 = vadd.f32 %v1396_v6, %v1350_v60  ;;  %v1907_v3 = vpop.f32.mrb[41].mxu0 }
0x143d   :  { %v1399_v25 = vpop.f32.mrb[42].mxu0  ;;  %v14_v3 = vstv %s2519_s8 }
0x143e   :  { %v1402_v63 = vadd.f32 %v2208_v42, %v1397_v1  ;;  %v1459_v4 = vpop.f32.mrb[40].mxu1  ;;  %v1908_v10 = vpop.f32.mrb[43].mxu0  ;;  %15 = vst [vmem:[#allocation2] sm:$0x1] %v14_v3 }
0x143f   :  { %v1465_v12 = vadd.f32 %v1459_v4, %v124_v26  ;;  %v1915_v27 = vpop.f32.mrb[41].mxu1 }
0x1440   :  { %2025 = vtanh.f32 %v1402_v63  ;;  %v1462_v9 = vpop.f32.mrb[42].mxu1  ;;  %v1403_v15 = vmul.f32 0.5, %v1402_v63 }
0x1441   :  { %2027 = vtanh.f32 %v1465_v12  ;;  %v1916_v13 = vpop.f32.mrb[43].mxu1  ;;  %v1466_v16 = vmul.f32 0.5, %v1465_v12 }
0x1442   :  { %2029 = vtanh.f32 %v1403_v15 }
0x1443   :  { %2031 = vtanh.f32 %v1466_v16 }
0x1445   :  { %v1668_v12 = vld [vmem:[#allocation2] ss:$0 sm:$0xff] }
0x144a   :  { %v2026_v14 = vpop.eup %2025 }
0x144b   :  { %v2028_v28 = vpop.eup %2027  ;;  %1410 = vrot.lane.b32.xlu0 %v2026_v14, %s2055_s19 }
0x144c   :  { %1473 = vrot.lane.b32.xlu1 %v2028_v28, %s2055_s19  ;;  %v2030_v11 = vpop.eup %2029 }
0x144d   :  { %v2032_v42 = vpop.eup %2031  ;;  %v1405_v17 = vmul.f32 0.5, %v2030_v11 }
0x144e   :  { %v1468_v18 = vmul.f32 0.5, %v2032_v42 }
0x144f   :  { %v1406_v19 = vadd.f32 0.5, %v1405_v17 }
0x1450   :  { %v1469_v20 = vadd.f32 0.5, %v1468_v18 }
0x1451   :  { %v1408_v8 = vmul.f32 %v1406_v19, %v2430_v36 }
0x1452   :  { %v1471_v29 = vmul.f32 %v1469_v20, %v2434_v39 }
0x14bd   :  { %v1411_v5 = vpop.permute.xlu0 %1410 }
0x14be   :  { %v1413_v21 = vmul.f32 %v1411_v5, %v1406_v19  ;;  %v1474_v22 = vpop.permute.xlu1 %1473 }
0x14bf   :  { %v1476_v23 = vmul.f32 %v1474_v22, %v1469_v20 }
0x14c0   :  { %1415 = vrot.lane.b32.xlu0 %v1413_v21, %s2056_s20 }
0x14c1   :  { %1478 = vrot.lane.b32.xlu1 %v1476_v23, %s2056_s20 }
0x1532   :  { %v1416_v24 = vpop.permute.xlu0 %1415 }
0x1533   :  { %v1418_v30 = vadd.f32 %v1416_v24, %v1408_v8  ;;  %v1479_v31 = vpop.permute.xlu1 %1478 }
0x1534   :  { %v1481_v32 = vadd.f32 %v1479_v31, %v1471_v29 }
0x1535   :  { %2033 = vtanh.f32 %v1418_v30 }
0x1536   :  { %2035 = vtanh.f32 %v1481_v32 }
0x153f   :  { %v2034_v33 = vpop.eup %2033 }
0x1540   :  { %v2036_v34 = vpop.eup %2035  ;;  %1421 = vrot.lane.b32.xlu0 %v2034_v33, %s2055_s19 }
0x1541   :  { %1484 = vrot.lane.b32.xlu1 %v2036_v34, %s2055_s19 }
0x15b2   :  { %v1422_v35 = vpop.permute.xlu0 %1421 }
0x15b3   :  { %v1424_v37 = vmul.f32 %v1422_v35, %v1406_v19  ;;  %v1485_v38 = vpop.permute.xlu1 %1484 }
0x15b4   :  { %v1487_v40 = vmul.f32 %v1485_v38, %v1469_v20 }
0x15b5   :  { %v1489_v41 = vpack.c.bf16 %v1424_v37, %v1424_v37 }
0x15b6   :  { %v1488_v36 = vpack.c.bf16 %v1487_v40, %v1487_v40 }
0x15b7   :  { %1491 = vrot.lane.b32.xlu0 %v1489_v41, %s2056_s20 }
0x15b8   :  { %1537 = vrot.lane.b32.xlu1 %v1488_v36, %s2056_s20 }
0x1629   :  { %v1492_v39 = vpop.permute.xlu0 %1491 }
0x162a   :  { %v1538_v43 = vpop.permute.xlu1 %1537  ;;  %1922 = vmatmul.mubr.msk.bf16.vlgmr.msra.gmra.mrb[44].mxu0 %vm144_vm1, %v1492_v39 }
0x162b   :  { %1930 = vmatmul.mubr.msk.bf16.vlgmr.msra.gmra.mrb[44].mxu1 %vm144_vm1, %v1538_v43 }
0x16fd   :  { %v1530_v44 = vpop.f32.mrb[44].mxu0 }
0x16fe   :  { %v1576_v45 = vpop.f32.mrb[44].mxu1  ;;  %v1923_v46 = vpop.f32.mrb[45].mxu0 }
0x16ff   :  { %v1577_v47 = vadd.f32 %v1576_v45, %v1530_v44  ;;  %v1931_v48 = vpop.f32.mrb[45].mxu1  ;;  %v1533_v49 = vpop.f32.mrb[46].mxu0 }
0x1700   :  { %v1579_v50 = vpop.f32.mrb[46].mxu1  ;;  %v1924_v51 = vpop.f32.mrb[47].mxu0 }
0x1701   :  { %v1582_v53 = vadd.f32 %v2051_v52, %v1577_v47  ;;  %v1932_v54 = vpop.f32.mrb[47].mxu1 }
0x1703   :  { %2037 = vtanh.f32 %v1582_v53  ;;  %v1583_v57 = vmul.f32 0.5, %v1582_v53 }
0x1705   :  { %2039 = vtanh.f32 %v1583_v57 }
0x170d   :  { %v2038_v56 = vpop.eup %2037 }
0x170e   :  { %1590 = vrot.lane.b32.xlu0 %v2038_v56, %s2055_s19 }
0x170f   :  { %v2040_v55 = vpop.eup %2039 }
0x1710   :  { %v1585_v59 = vmul.f32 0.5, %v2040_v55 }
0x1712   :  { %v1586_v60 = vadd.f32 0.5, %v1585_v59 }
0x1714   :  { %v1588_v2 = vmul.f32 %v1586_v60, %v1418_v30 }
0x1780   :  { %v1591_v58 = vpop.permute.xlu0 %1590 }
0x1781   :  { %v1593_v62 = vmul.f32 %v1591_v58, %v1586_v60 }
0x1783   :  { %1595 = vrot.lane.b32.xlu1 %v1593_v62, %s2056_s20 }
0x1787   :  { %1611 = vrot.lane.b32.xlu1 %v1667_v61, %s2057_s6 }
0x17f5   :  { %v1596_v0 = vpop.permute.xlu1 %1595 }
0x17f6   :  { %v1598_v6 = vadd.f32 %v1596_v0, %v1588_v2 }
0x17f8   :  { %2041 = vtanh.f32 %v1598_v6 }
0x17f9   :  { %v1612_v7 = vpop.permute.xlu1 %1611 }
0x1802   :  { %v2042_v1 = vpop.eup %2041 }
0x1803   :  { %1601 = vrot.lane.b32.xlu0 %v2042_v1, %s2055_s19 }
0x1875   :  { %v1602_v25 = vpop.permute.xlu0 %1601 }
0x1876   :  { %v1604_v26 = vmul.f32 %v1602_v25, %v1586_v60 }
0x1878   :  { %v1614_v63 = vmul.f32 %v1612_v7, %v1604_v26 }
0x187a   :  { %1616 = vrot.lane.b32.xlu0 %v1614_v63, %s2056_s20 }
0x18ec   :  { %v1617_v4 = vpop.permute.xlu0 %1616 }
0x18ed   :  { %v1619_v10 = vsel %vm144_vm1, %v1617_v4, 0.0 }
0x18ee   :  { %1620 = vadd.xlane.f32.xlu1 %v1619_v10 }
0x197b   :  { %v1621_v27 = vpop.xlane.xlu1 %1620 }
0x197c   :  { %v1629_v9 = vadd.f32 %v1668_v12, %v1621_v27 }
0x197e   :  { %1631 = vst.msk [vmem:[%s2520_s9] sm:$0xff] %vm1630_vm2, %v1629_v9 }

</bundles_post_ra>
